<compile_context>
chip_gen: v7x
topology: tpu7x:2x2x1
jax: 0.10.0
libtpu: 0.0.40
codegen_flags: <defaults>
</compile_context>

<pallas_src>
import functools

import numpy as np
import jax
import jax.numpy as jnp
from jax import lax
from jax.experimental import pallas as pl
from jax.experimental.pallas import tpu as pltpu

_VMEM_LIMIT = 32 * 1024 * 1024   # scoped VMEM limit: safe on v5e/v6e/v7x
_K_BUDGET = 16 * 1024 * 1024     # double-buffered input working-set budget


def _rup(x, m):
    return (x + m - 1) // m * m


def _pick_tile(d, pref):
    """Tile size + padded extent.  Prefer large tiles; pad the dimension up
    (<=25% waste) rather than collapsing to degenerate 128-wide tiles."""
    dp = _rup(d, 128)
    if dp <= pref:
        return dp, dp
    for t in range(pref, 127, -128):
        total = _rup(dp, t)
        if (total - dp) * 4 <= dp:          # <= 25% padding waste
            return t, total
    return 128, dp


def _pick_k(K, ntaps, tm, tn):
    """K tiling: full-dim block for small 8-aligned K (e.g. Cin=64, no pad),
    else the largest 128-multiple divisor of the padded K that keeps the
    double-buffered inputs inside the VMEM budget."""
    if K % 8 == 0 and 64 <= K <= 1024 and K % 128 != 0:
        return K, K
    Kp = _rup(K, 128)
    per_k = ntaps * (tm + tn) * 2 * 2        # bf16, double-buffered, per tk unit
    cap = min(1024, max(128, (_K_BUDGET // per_k) // 128 * 128))
    if Kp <= cap:
        return Kp, Kp
    tk = 128
    for t in range(256, cap + 1, 128):
        if Kp % t == 0:
            tk = t
    return tk, Kp


# ---------------------------------------------------------------------------
# Pallas kernel: multi-tap bf16 matmul, f32 accumulate, fused affine (BN/bias),
# optional residual add, activation and post-scale in the epilogue, bf16 store.
# ---------------------------------------------------------------------------
def _matmul_taps(taps, weights, scale, bias, residual=None, *, act="none",
                 post_scale=1.0, out_dtype=jnp.bfloat16):
    """post_scale * act(scale * sum_t(taps[t] @ weights[t]) + bias [+ res]).

    taps[t]: (M, K) / weights[t]: (K, Nc); scale/bias: (Nc,); residual (M, Nc).
    Operands go to the MXU in bf16; accumulation + epilogue are f32; the
    result is stored as `out_dtype` (bf16 activations, f32 disparity heads).
    """
    ntaps = len(taps)
    assert len(weights) == ntaps
    M, K = taps[0].shape
    Nc = weights[0].shape[1]

    tm, Mp = _pick_tile(M, 1024 if ntaps == 1 else 512)
    tn, Np = _pick_tile(Nc, 512)
    tk, Kp = _pick_k(K, ntaps, tm, tn)

    taps = [t.astype(jnp.bfloat16) for t in taps]
    weights = [w.astype(jnp.bfloat16) for w in weights]
    if (Mp, Kp) != (M, K):
        taps = [jnp.pad(t, ((0, Mp - M), (0, Kp - K))) for t in taps]
    if (Kp, Np) != (K, Nc):
        weights = [jnp.pad(w, ((0, Kp - K), (0, Np - Nc))) for w in weights]
    s = scale.astype(jnp.float32).reshape(1, Nc)
    c = bias.astype(jnp.float32).reshape(1, Nc)
    if Np != Nc:
        s = jnp.pad(s, ((0, 0), (0, Np - Nc)))
        c = jnp.pad(c, ((0, 0), (0, Np - Nc)))

    has_res = residual is not None
    inputs = list(taps) + list(weights) + [s, c]
    in_specs = ([pl.BlockSpec((tm, tk), lambda i, j, k: (i, k))
                 for _ in range(ntaps)]
                + [pl.BlockSpec((tk, tn), lambda i, j, k: (k, j))
                   for _ in range(ntaps)]
                + [pl.BlockSpec((1, tn), lambda i, j, k: (0, j)),
                   pl.BlockSpec((1, tn), lambda i, j, k: (0, j))])
    if has_res:
        r = residual.astype(jnp.bfloat16)
        if (Mp, Np) != (M, Nc):
            r = jnp.pad(r, ((0, Mp - M), (0, Np - Nc)))
        inputs.append(r)
        in_specs.append(pl.BlockSpec((tm, tn), lambda i, j, k: (i, j)))

    def kernel(*refs):
        a_refs = refs[:ntaps]
        b_refs = refs[ntaps:2 * ntaps]
        s_ref = refs[2 * ntaps]
        c_ref = refs[2 * ntaps + 1]
        r_ref = refs[2 * ntaps + 2] if has_res else None
        o_ref = refs[-2]
        acc_ref = refs[-1]

        @pl.when(pl.program_id(2) == 0)
        def _():
            acc_ref[...] = jnp.zeros_like(acc_ref)

        acc = acc_ref[...]
        for a_r, b_r in zip(a_refs, b_refs):
            acc = acc + jnp.dot(a_r[...], b_r[...],
                                preferred_element_type=jnp.float32)
        acc_ref[...] = acc

        @pl.when(pl.program_id(2) == pl.num_programs(2) - 1)
        def _():
            y = acc_ref[...] * s_ref[...] + c_ref[...]
            if r_ref is not None:
                y = y + r_ref[...].astype(jnp.float32)
            if act == "relu":
                y = jnp.maximum(y, 0.0)
            elif act == "elu":
                y = jnp.where(y > 0.0, y, jnp.expm1(jnp.minimum(y, 0.0)))
            elif act == "sigmoid":
                y = jax.nn.sigmoid(y)
            if post_scale != 1.0:
                y = y * post_scale
            o_ref[...] = y.astype(o_ref.dtype)

    out = pl.pallas_call(
        kernel,
        out_shape=jax.ShapeDtypeStruct((Mp, Np), out_dtype),
        grid_spec=pltpu.PrefetchScalarGridSpec(
            num_scalar_prefetch=0,
            grid=(Mp // tm, Np // tn, Kp // tk),
            in_specs=in_specs,
            out_specs=pl.BlockSpec((tm, tn), lambda i, j, k: (i, j)),
            scratch_shapes=[pltpu.VMEM((tm, tn), jnp.float32)]),
        compiler_params=pltpu.CompilerParams(
            dimension_semantics=("parallel", "parallel", "arbitrary"),
            vmem_limit_bytes=_VMEM_LIMIT),
    )(*inputs)
    if (Mp, Np) != (M, Nc):
        out = out[:M, :Nc]
    return out


# ---------------------------------------------------------------------------
# Conv wrappers (tap views built inside the jit, matmuls in Pallas)
# ---------------------------------------------------------------------------
# TODO(synk): a halo-block Pallas conv (shifting taps inside the kernel) would
# remove the remaining kh*kw-fold tap materialisation for 3x3/7x7 convs.
@functools.partial(jax.jit,
                   static_argnames=("stride", "padding", "act", "post_scale"))
def conv2d(x, w, scale, bias, residual=None, *, stride=1, padding=0,
           act="none", post_scale=1.0):
    """x: NHWC, w: (kh, kw, Cin[_padded], Cout) bf16. Returns NHWC bf16."""
    N, H, W, Cin = x.shape
    kh, kw, wcin, Cout = w.shape
    Ho = (H + 2 * padding - kh) // stride + 1
    Wo = (W + 2 * padding - kw) // stride + 1
    xb = x.astype(jnp.bfloat16)

    if kh == 1 and kw == 1:
        if stride != 1:
            xb = lax.slice(xb, (0, 0, 0, 0),
                           (N, (Ho - 1) * stride + 1, (Wo - 1) * stride + 1, Cin),
                           (1, stride, stride, 1))
        taps = [xb.reshape(N * Ho * Wo, Cin)]
        wts = [w.reshape(Cin, Cout)]
    elif kh * kw * Cin <= 256:
        # tiny-Cin conv (the 7x7 / Cin=3 stem): one concatenated-patch matmul
        xp = jnp.pad(xb, ((0, 0), (padding, padding), (padding, padding), (0, 0)))
        patches = []
        for i in range(kh):
            for j in range(kw):
                p = lax.slice(
                    xp, (0, i, j, 0),
                    (N, i + (Ho - 1) * stride + 1, j + (Wo - 1) * stride + 1, Cin),
                    (1, stride, stride, 1))
                patches.append(p.reshape(N * Ho * Wo, Cin))
        taps = [jnp.concatenate(patches, axis=-1)]
        wts = [w.reshape(kh * kw * Cin, Cout)]
    else:
        # multi-tap conv: kh*kw shifted views fed as separate kernel inputs.
        # Channel padding (awkward decoder counts) is fused into the spatial
        # pad; the weights were pre-padded with zero Cin rows at init.
        cpad = wcin - Cin
        xp = jnp.pad(xb, ((0, 0), (padding, padding), (padding, padding),
                          (0, cpad)))
        taps = []
        for i in range(kh):
            for j in range(kw):
                p = lax.slice(
                    xp, (0, i, j, 0),
                    (N, i + (Ho - 1) * stride + 1, j + (Wo - 1) * stride + 1,
                     Cin + cpad),
                    (1, stride, stride, 1))
                taps.append(p.reshape(N * Ho * Wo, Cin + cpad))
        wts = [w[i, j] for i in range(kh) for j in range(kw)]

    r2 = None if residual is None else residual.reshape(N * Ho * Wo, Cout)
    out = _matmul_taps(taps, wts, scale, bias, residual=r2, act=act,
                       post_scale=post_scale, out_dtype=jnp.bfloat16)
    return out.reshape(N, Ho, Wo, Cout)


@functools.partial(jax.jit, static_argnames=("act",))
def conv_transpose2d(x, w_taps, bias4, *, act="elu"):
    """ConvTranspose2d(k=3, s=2, p=1, op=1) via 4-phase subpixel decomposition.

    w_taps: 4 matrices (Cin, 4*Cout) built at init from the flipped kernel;
    output pixel (2i+r, 2j+s) = phase_{rs}(i, j). No zero-dilated input, and
    the pixel shuffle is a single reshape/transpose.
    """
    N, H, W, Cin = x.shape
    c4 = w_taps[0].shape[1]
    cout = c4 // 4
    xb = x.astype(jnp.bfloat16)
    xp = jnp.pad(xb, ((0, 0), (0, 1), (0, 1), (0, 0)))
    taps = [xp[:, :H, :W, :].reshape(N * H * W, Cin),
            xp[:, :H, 1:, :].reshape(N * H * W, Cin),
            xp[:, 1:, :W, :].reshape(N * H * W, Cin),
            xp[:, 1:, 1:, :].reshape(N * H * W, Cin)]
    scale = jnp.ones((c4,), jnp.float32)
    out = _matmul_taps(taps, list(w_taps), scale, bias4, act=act,
                       out_dtype=jnp.bfloat16)                  # (M, 4*Cout)
    out = out.reshape(N, H, W, 2, 2, cout)
    out = jnp.transpose(out, (0, 1, 3, 2, 4, 5))                # (N,H,2,W,2,C)
    return out.reshape(N, 2 * H, 2 * W, cout)


# Both disp heads (L/R) of a scale fused into one Cout=2 matmul; f32 output.
@functools.partial(jax.jit, static_argnames=("post_scale",))
def _disp_pair(x, wL, bL, wR, bR, *, post_scale):
    N, H, W, Cin = x.shape
    A = x.astype(jnp.bfloat16).reshape(N * H * W, Cin)
    B = jnp.concatenate([wL.reshape(Cin, 1), wR.reshape(Cin, 1)], axis=1)
    bias = jnp.concatenate([bL.reshape(1), bR.reshape(1)])
    scale = jnp.ones((2,), jnp.float32)
    out = _matmul_taps([A], [B], scale, bias, act="sigmoid",
                       post_scale=post_scale, out_dtype=jnp.float32)
    out = out.reshape(N, H, W, 2)
    return out[..., 0:1], out[..., 1:2]


def disp_pair(x, pL, pR, mult):
    return _disp_pair(x, pL["w"], pL["bias"], pR["w"], pR["bias"],
                      post_scale=float(mult))


def maxpool3x3s2p1(x):  # NHWC
    """3x3/stride-2/pad-1 maxpool as a pairwise max tree over strided views of
    the padded input (fused by XLA into one pass; no HBM tap stack)."""
    N, H, W, C = x.shape
    Ho = (H + 2 - 3) // 2 + 1
    Wo = (W + 2 - 3) // 2 + 1
    pad_val = float(jnp.finfo(x.dtype).min)
    xp = jnp.pad(x, ((0, 0), (1, 1), (1, 1), (0, 0)), constant_values=pad_val)
    out = None
    for i in range(3):
        for j in range(3):
            v = lax.slice(xp, (0, i, j, 0),
                          (N, i + (Ho - 1) * 2 + 1, j + (Wo - 1) * 2 + 1, C),
                          (1, 2, 2, 1))
            out = v if out is None else jnp.maximum(out, v)
    return out


def upsample_nearest(x, out_h, out_w):
    """torch nn.Upsample(mode='nearest') — exact integer factor uses broadcast."""
    N, H, W, C = x.shape
    if out_h % H == 0 and out_w % W == 0:
        fh, fw = out_h // H, out_w // W
        y = jnp.broadcast_to(x[:, :, None, :, None, :], (N, H, fh, W, fw, C))
        return y.reshape(N, out_h, out_w, C)
    ri = (jnp.arange(out_h) * H) // out_h
    ci = (jnp.arange(out_w) * W) // out_w
    return x[:, ri][:, :, ci]


# ---------------------------------------------------------------------------
# Deterministic parameter init (synthetic — no pretrained checkpoint)
# ---------------------------------------------------------------------------
class PRNG:
    def __init__(self, seed=0):
        self.key = jax.random.PRNGKey(seed)
        self.cnt = 0

    def normal(self, shape):
        self.cnt += 1
        return jax.random.normal(jax.random.fold_in(self.key, self.cnt),
                                 shape, jnp.float32)


def _pad_cin_weight(w):
    """Zero-pad the Cin axis of a spatial conv weight to a multiple of 128 so
    the activation's channel pad can be fused into its spatial pad."""
    cin = w.shape[2]
    if cin >= 128 and cin % 128:
        w = jnp.pad(w, ((0, 0), (0, 0), (0, _rup(cin, 128) - cin), (0, 0)))
    return w


def init_conv_bn(pr, kh, kw, cin, cout):
    """Conv (no bias) + eval-mode BatchNorm folded to per-channel scale/bias."""
    w = pr.normal((kh, kw, cin, cout)) / np.sqrt(kh * kw * cin)
    if kh * kw > 1:
        w = _pad_cin_weight(w)
    gamma = 1.0 + 0.05 * pr.normal((cout,))
    beta = 0.02 * pr.normal((cout,))
    mean = 0.01 * pr.normal((cout,))
    var = jnp.abs(1.0 + 0.05 * pr.normal((cout,)))
    scale = gamma / jnp.sqrt(var + 1e-5)
    bias = beta - scale * mean
    return {"w": w.astype(jnp.bfloat16), "scale": scale, "bias": bias}


def init_conv_b(pr, k, cin, cout):
    """Plain Conv2d with bias (decoder convs / disp heads)."""
    w = pr.normal((k, k, cin, cout)) / np.sqrt(k * k * cin)
    if k > 1:
        w = _pad_cin_weight(w)
    b = 0.01 * pr.normal((cout,))
    return {"w": w.astype(jnp.bfloat16),
            "scale": jnp.ones((cout,), jnp.float32), "bias": b}


def init_convT(pr, cin, cout, k=3):
    """ConvTranspose2d(k=3,s=2,p=1,op=1) -> 4 subpixel tap matrices (Cin,4Cout).

    Columns ordered [p00, p01, p10, p11]; taps [t00, t01, t10, t11] where
    t_{ab} = x[i+a, j+b] (zero-padded at bottom/right):
        p00 = wf[1,1]·t00
        p01 = wf[1,0]·t00 + wf[1,2]·t01
        p10 = wf[0,1]·t00 + wf[2,1]·t10
        p11 = wf[0,0]·t00 + wf[0,2]·t01 + wf[2,0]·t10 + wf[2,2]·t11
    with wf the spatially-flipped kernel (standard transpose-conv equivalence).
    """
    w_t = pr.normal((cin, cout, k, k)) / np.sqrt(k * k * cin)
    wf = jnp.transpose(w_t[:, :, ::-1, ::-1], (2, 3, 0, 1))  # (k, k, cin, cout)
    b = 0.01 * pr.normal((cout,))
    Z = jnp.zeros((cin, cout), jnp.float32)
    w_t00 = jnp.concatenate([wf[1, 1], wf[1, 0], wf[0, 1], wf[0, 0]], axis=1)
    w_t01 = jnp.concatenate([Z,        wf[1, 2], Z,        wf[0, 2]], axis=1)
    w_t10 = jnp.concatenate([Z,        Z,        wf[2, 1], wf[2, 0]], axis=1)
    w_t11 = jnp.concatenate([Z,        Z,        Z,        wf[2, 2]], axis=1)
    w_taps = tuple(m.astype(jnp.bfloat16) for m in (w_t00, w_t01, w_t10, w_t11))
    return {"w_taps": w_taps, "bias4": jnp.tile(b, 4)}


def init_bottleneck(pr, cin, mid, cout, stride, downsample):
    return {
        "c1": init_conv_bn(pr, 1, 1, cin, mid),
        "c2": init_conv_bn(pr, 3, 3, mid, mid),
        "c3": init_conv_bn(pr, 1, 1, mid, cout),
        "ds": init_conv_bn(pr, 1, 1, cin, cout) if downsample else None,
        "stride": stride,
    }


def init_layer(pr, cin, mid, cout, blocks, stride):
    ps = [init_bottleneck(pr, cin, mid, cout, stride, True)]
    for _ in range(blocks - 1):
        ps.append(init_bottleneck(pr, cout, mid, cout, 1, False))
    return ps


def init_net_params(seed=0):
    pr = PRNG(seed)
    P = {}
    # ResNet-50 encoder
    P["conv1"] = init_conv_bn(pr, 7, 7, 3, 64)
    P["layer1"] = init_layer(pr, 64, 64, 256, 3, 1)
    P["layer2"] = init_layer(pr, 256, 128, 512, 4, 2)
    P["layer3"] = init_layer(pr, 512, 256, 1024, 6, 2)
    P["layer4"] = init_layer(pr, 1024, 512, 2048, 3, 2)
    # Decoder
    P["d1_UC"] = init_convT(pr, 2048, 1024)
    P["d1_dispL"] = init_conv_b(pr, 1, 2048, 1)
    P["d1_dispR"] = init_conv_b(pr, 1, 2048, 1)
    P["d1_C"] = init_conv_b(pr, 3, 2050, 1024)
    P["d2_UC"] = init_convT(pr, 1024, 512)
    P["d2_dispL"] = init_conv_b(pr, 1, 1024, 1)
    P["d2_dispR"] = init_conv_b(pr, 1, 1024, 1)
    P["d2_C"] = init_conv_b(pr, 3, 1026, 512)
    P["d3_UC"] = init_convT(pr, 512, 256)
    P["d3_dispL"] = init_conv_b(pr, 1, 512, 1)
    P["d3_dispR"] = init_conv_b(pr, 1, 512, 1)
    P["d3_C"] = init_conv_b(pr, 3, 514, 256)
    P["d4_C1"] = init_conv_b(pr, 3, 256, 64)
    P["d4_dispL"] = init_conv_b(pr, 1, 256, 1)
    P["d4_dispR"] = init_conv_b(pr, 1, 256, 1)
    P["d4_C2"] = init_conv_b(pr, 3, 130, 64)
    P["d5_UC1"] = init_convT(pr, 64, 16)
    P["d5_UC2"] = init_convT(pr, 16, 4)
    P["d5_dispL"] = init_conv_b(pr, 1, 4, 1)
    P["d5_dispR"] = init_conv_b(pr, 1, 4, 1)
    return P
    # (dec_lay*_bn layers exist in __init__ but are never used in forward.)


# ---------------------------------------------------------------------------
# Network forward (eval mode, right_img=None -> (None, dec5_dispL))
# ---------------------------------------------------------------------------
def bottleneck(x, p):
    out = conv2d(x, p["c1"]["w"], p["c1"]["scale"], p["c1"]["bias"],
                 stride=1, padding=0, act="relu")
    out = conv2d(out, p["c2"]["w"], p["c2"]["scale"], p["c2"]["bias"],
                 stride=p["stride"], padding=1, act="relu")
    if p["ds"] is None:
        identity = x
    else:
        identity = conv2d(x, p["ds"]["w"], p["ds"]["scale"], p["ds"]["bias"],
                          stride=p["stride"], padding=0, act="none")
    # conv3 + BN + residual add + ReLU fused in one Pallas matmul epilogue.
    return conv2d(out, p["c3"]["w"], p["c3"]["scale"], p["c3"]["bias"],
                  residual=identity, stride=1, padding=0, act="relu")


def run_layer(x, blocks):
    for p in blocks:
        x = bottleneck(x, p)
    return x


def dec_conv(x, p, act="elu"):
    return conv2d(x, p["w"], p["scale"], p["bias"], stride=1, padding=1, act=act)


def _bf(x):
    return x.astype(jnp.bfloat16)


def net_forward(params, left_img_nchw, right_img_nchw=None):
    P = params
    img_w = left_img_nchw.shape[3]
    x = jnp.transpose(left_img_nchw, (0, 2, 3, 1)).astype(jnp.bfloat16)  # NHWC

    # ---------------- encoder (ResNet-50) ----------------
    c = P["conv1"]
    e = conv2d(x, c["w"], c["scale"], c["bias"], stride=2, padding=3, act="relu")
    enc0 = maxpool3x3s2p1(e)
    enc1 = run_layer(enc0, P["layer1"])
    enc2 = run_layer(enc1, P["layer2"])
    enc3 = run_layer(enc2, P["layer3"])
    enc4 = run_layer(enc3, P["layer4"])

    enc4_w = enc4.shape[2]
    enc3_h, enc3_w = enc3.shape[1], enc3.shape[2]
    enc2_h, enc2_w = enc2.shape[1], enc2.shape[2]
    enc1_h, enc1_w = enc1.shape[1], enc1.shape[2]

    # ---------------- decoder ----------------
    dec1 = conv_transpose2d(enc4, P["d1_UC"]["w_taps"], P["d1_UC"]["bias4"], act="elu")
    d1L, d1R = disp_pair(enc4, P["d1_dispL"], P["d1_dispR"], 0.3 * enc4_w)
    d1L_up = upsample_nearest(d1L, enc3_h, enc3_w)
    d1R_up = upsample_nearest(d1R, enc3_h, enc3_w)
    dec1 = jnp.concatenate([dec1, enc3, _bf(d1R_up), _bf(d1L_up)], axis=-1)  # 2050
    dec1 = dec_conv(dec1, P["d1_C"], act="elu")

    dec2 = conv_transpose2d(dec1, P["d2_UC"]["w_taps"], P["d2_UC"]["bias4"], act="elu")
    d2L, d2R = disp_pair(dec1, P["d2_dispL"], P["d2_dispR"], 0.3 * enc3_w)
    d2L_up = upsample_nearest(d2L, enc2_h, enc2_w)
    d2R_up = upsample_nearest(d2R, enc2_h, enc2_w)
    dec2 = jnp.concatenate([dec2, enc2, _bf(d2R_up), _bf(d2L_up)], axis=-1)  # 1026
    dec2 = dec_conv(dec2, P["d2_C"], act="elu")

    dec3 = conv_transpose2d(dec2, P["d3_UC"]["w_taps"], P["d3_UC"]["bias4"], act="elu")
    d3L, d3R = disp_pair(dec2, P["d3_dispL"], P["d3_dispR"], 0.3 * enc2_w)
    d3L_up = upsample_nearest(d3L, enc1_h, enc1_w)
    d3R_up = upsample_nearest(d3R, enc1_h, enc1_w)
    dec3 = jnp.concatenate([dec3, enc1, _bf(d3R_up), _bf(d3L_up)], axis=-1)  # 514
    dec3 = dec_conv(dec3, P["d3_C"], act="elu")

    dec4 = dec_conv(dec3, P["d4_C1"], act="elu")
    d4L, d4R = disp_pair(dec3, P["d4_dispL"], P["d4_dispR"], 0.3 * enc1_w)
    dec4 = jnp.concatenate([dec4, enc0, _bf(d4R), _bf(d4L)], axis=-1)  # 130
    dec4 = dec_conv(dec4, P["d4_C2"], act="elu")

    dec5 = conv_transpose2d(dec4, P["d5_UC1"]["w_taps"], P["d5_UC1"]["bias4"], act="elu")
    dec5 = conv_transpose2d(dec5, P["d5_UC2"]["w_taps"], P["d5_UC2"]["bias4"], act="elu")
    d5L, d5R = disp_pair(dec5, P["d5_dispL"], P["d5_dispR"], 0.3 * img_w)
    del d5R  # computed (as in the reference forward) but not returned in eval

    # TODO(synk): the training-time photometric `Loss` class (scale_img +
    # reconstruction losses) is not defined in the provided module source;
    # with right_img=None the reference forward sets total_loss=None.
    total_loss = None
    dec5_dispL_nchw = jnp.transpose(d5L, (0, 3, 1, 2))  # (N, 1, H, W) f32
    return total_loss, dec5_dispL_nchw


# ---------------------------------------------------------------------------
if __name__ == "__main__":
    key = jax.random.PRNGKey(0)
    # Small-but-valid input: ResNet-50 needs 3 input channels and H,W
    # divisible by 32 for the encoder/decoder spatial sizes to line up.
    left_img = 0.5 * jax.random.normal(key, (2, 3, 64, 64), jnp.float32)

    params = init_net_params(seed=0)
    total_loss, dispL = net_forward(params, left_img, right_img_nchw=None)
    dispL = jax.block_until_ready(dispL)

    assert total_loss is None
    assert dispL.shape == (2, 1, 64, 64), dispL.shape
    assert bool(jnp.all(jnp.isfinite(dispL)))
    print("KERNEL_OK")
</pallas_src>

<mosaic_0001>
module attributes {stable_mosaic.version = 11 : i64} {
  func.func @kernel(%arg0: i32, %arg1: i32, %arg2: i32, %arg3: memref<1024x256xbf16, #tpu.memory_space<vmem>>, %arg4: memref<256x128xbf16, #tpu.memory_space<vmem>>, %arg5: memref<1x128xf32, #tpu.memory_space<vmem>>, %arg6: memref<1x128xf32, #tpu.memory_space<vmem>>, %arg7: memref<1024x128xbf16, #tpu.memory_space<vmem>>, %arg8: memref<1024x128xf32, #tpu.memory_space<vmem>>) attributes {dimension_semantics = [#tpu.dimension_semantics<parallel>, #tpu.dimension_semantics<parallel>, #tpu.dimension_semantics<arbitrary>], iteration_bounds = array<i64: 2, 1, 1>, scalar_prefetch = 0 : i64, scratch_operands = 1 : i64, tpu.core_type = #tpu.core_type<tc>, window_params = [{transform_indices = @transform_0, window_bounds = array<i64: 1024, 256>}, {transform_indices = @transform_1, window_bounds = array<i64: 256, 128>}, {transform_indices = @transform_2, window_bounds = array<i64: 1, 128>}, {transform_indices = @transform_3, window_bounds = array<i64: 1, 128>}, {transform_indices = @transform_4, window_bounds = array<i64: 1024, 128>}]} {
    %c0_i32 = arith.constant 0 : i32
    %0 = arith.cmpi eq, %arg2, %c0_i32 : i32
    %1 = arith.extui %0 : i1 to i32
    %c0_i32_0 = arith.constant 0 : i32
    %2 = arith.cmpi ne, %1, %c0_i32_0 : i32
    scf.if %2 {
      %cst_10 = arith.constant 0.000000e+00 : f32
      %12 = vector.broadcast %cst_10 : f32 to vector<1024x128xf32>
      %c0_11 = arith.constant 0 : index
      %c0_12 = arith.constant 0 : index
      %13 = vector.load %arg8[%c0_11, %c0_12] : memref<1024x128xf32, #tpu.memory_space<vmem>>, vector<1024x128xf32>
      tpu.vector_store %arg8[%c0_11, %c0_12], %12 {strides = array<i32>} : memref<1024x128xf32, #tpu.memory_space<vmem>>, vector<1024x128xf32>,
    } else {
    }
    %c0 = arith.constant 0 : index
    %c0_1 = arith.constant 0 : index
    %3 = vector.load %arg8[%c0, %c0_1] : memref<1024x128xf32, #tpu.memory_space<vmem>>, vector<1024x128xf32>
    %c0_2 = arith.constant 0 : index
    %c0_3 = arith.constant 0 : index
    %4 = vector.load %arg3[%c0_2, %c0_3] : memref<1024x256xbf16, #tpu.memory_space<vmem>>, vector<1024x256xbf16>
    %c0_4 = arith.constant 0 : index
    %c0_5 = arith.constant 0 : index
    %5 = vector.load %arg4[%c0_4, %c0_5] : memref<256x128xbf16, #tpu.memory_space<vmem>>, vector<256x128xbf16>
    %cst = arith.constant dense<0.000000e+00> : vector<1024x128xf32>
    %6 = tpu.matmul %4, %5, %cst {dimension_numbers = #tpu.dot_dimension_numbers<[1], [0], [0], [1], [0, 0, 1, 1], [], []>} : vector<1024x256xbf16>, vector<256x128xbf16>, vector<1024x128xf32> -> vector<1024x128xf32>
    %7 = arith.addf %3, %6 : vector<1024x128xf32>
    %c0_6 = arith.constant 0 : index
    %c0_7 = arith.constant 0 : index
    %8 = vector.load %arg8[%c0_6, %c0_7] : memref<1024x128xf32, #tpu.memory_space<vmem>>, vector<1024x128xf32>
    tpu.vector_store %arg8[%c0_6, %c0_7], %7 {strides = array<i32>} : memref<1024x128xf32, #tpu.memory_space<vmem>>, vector<1024x128xf32>,
    %c0_i32_8 = arith.constant 0 : i32
    %9 = arith.cmpi eq, %arg2, %c0_i32_8 : i32
    %10 = arith.extui %9 : i1 to i32
    %c0_i32_9 = arith.constant 0 : i32
    %11 = arith.cmpi ne, %10, %c0_i32_9 : i32
    scf.if %11 {
      %c0_10 = arith.constant 0 : index
      %c0_11 = arith.constant 0 : index
      %12 = vector.load %arg8[%c0_10, %c0_11] : memref<1024x128xf32, #tpu.memory_space<vmem>>, vector<1024x128xf32>
      %c0_12 = arith.constant 0 : index
      %c0_13 = arith.constant 0 : index
      %13 = vector.load %arg5[%c0_12, %c0_13] : memref<1x128xf32, #tpu.memory_space<vmem>>, vector<1x128xf32>
      %14 = vector.broadcast %13 : vector<1x128xf32> to vector<1024x128xf32>
      %15 = arith.mulf %12, %14 : vector<1024x128xf32>
      %c0_14 = arith.constant 0 : index
      %c0_15 = arith.constant 0 : index
      %16 = vector.load %arg6[%c0_14, %c0_15] : memref<1x128xf32, #tpu.memory_space<vmem>>, vector<1x128xf32>
      %17 = vector.broadcast %16 : vector<1x128xf32> to vector<1024x128xf32>
      %18 = arith.addf %15, %17 : vector<1024x128xf32>
      %cst_16 = arith.constant 0.000000e+00 : f32
      %19 = vector.broadcast %cst_16 : f32 to vector<1024x128xf32>
      %20 = arith.maximumf %18, %19 : vector<1024x128xf32>
      %21 = arith.truncf %20 : vector<1024x128xf32> to vector<1024x128xbf16>
      %c0_17 = arith.constant 0 : index
      %c0_18 = arith.constant 0 : index
      %22 = vector.load %arg7[%c0_17, %c0_18] : memref<1024x128xbf16, #tpu.memory_space<vmem>>, vector<1024x128xbf16>
      tpu.vector_store %arg7[%c0_17, %c0_18], %21 {strides = array<i32>} : memref<1024x128xbf16, #tpu.memory_space<vmem>>, vector<1024x128xbf16>,
    } else {
    }
    return
  }
  func.func @transform_0(%arg0: i32, %arg1: i32, %arg2: i32) -> (i32, i32) {
    %c0_i32 = arith.constant 0 : i32
    return %arg0, %arg2 : i32, i32
  }
  func.func @transform_1(%arg0: i32, %arg1: i32, %arg2: i32) -> (i32, i32) {
    %c0_i32 = arith.constant 0 : i32
    return %arg2, %arg1 : i32, i32
  }
  func.func @transform_2(%arg0: i32, %arg1: i32, %arg2: i32) -> (i32, i32) {
    %c0_i32 = arith.constant 0 : i32
    %c0_i32_0 = arith.constant 0 : i32
    return %c0_i32, %arg1 : i32, i32
  }
  func.func @transform_3(%arg0: i32, %arg1: i32, %arg2: i32) -> (i32, i32) {
    %c0_i32 = arith.constant 0 : i32
    %c0_i32_0 = arith.constant 0 : i32
    return %c0_i32, %arg1 : i32, i32
  }
  func.func @transform_4(%arg0: i32, %arg1: i32, %arg2: i32) -> (i32, i32) {
    %c0_i32 = arith.constant 0 : i32
    return %arg0, %arg1 : i32, i32
  }
}

</mosaic_0001>

<bundles_post_ra>
// kernel: conv2d.1
= control target key start
LH: loop header
LB: loop body
LE: loop exit
PB: predicated region body
PF: predicated region fallthrough
CT: control target
= control target key end

     0   :  { %9 = vsyncpa [#allocation4], 0  ;;  %s5449_s0 = inlined_call_operand.vmem [shape: bf16[2048,256], index: 0, kind: input, shape index: {}]   ;;  %s5450_s1 = inlined_call_operand.vmem [shape: bf16[256,128], index: 1, kind: input, shape index: {}]   ;;  %s5451_s2 = inlined_call_operand.vmem [shape: f32[1,128], index: 2, kind: input, shape index: {}]   ;;  %s5452_s3 = inlined_call_operand.vmem [shape: f32[1,128], index: 3, kind: input, shape index: {}]   ;;  %s5453_s4 = inlined_call_operand.hbm [shape: bf16[2048,128], index: 4, kind: output, shape index: {}]  }
   0x1   :  { %11 = vsyncpa [#allocation4 + $0x1], 0  ;;  %s4778_s15 = smov 0   ;;  %s4780_s16 = smov 0  }
   0x2   :  { %s4782_s17 = smov 0   ;;  %s4784_s18 = smov 0  }
   0x3   :  { %s4786_s19 = smov 0   ;;  %s4788_s20 = smov 0  }
   0x4 LB: > { %s3565_s21 = sadd.s32 4294967295, %s4747_s20   ;;  %s3566_s22 = sadd.s32 4294967294, %s4747_s20   ;;  %s4747_s20 = sphi %s4788_s20, %s17_s20   ;;  %s4743_s19 = sphi %s4786_s19, %s5460_s19   ;;  %s4739_s18 = sphi %s4784_s18, %s5459_s18   ;;  %s4735_s17 = sphi %s4782_s17, %s5458_s17   ;;  %s4731_s16 = sphi %s4780_s16, %s5457_s16   ;;  %s4727_s15 = sphi %s4778_s15, %s5456_s15  }
   0x5   : > { %s36_s23 = sadd.s32 1, %s4743_s19  ;;  %s153_s24 = sadd.s32 1, %s4735_s17 }
   0x6   : > { %p38_p0 = scmp.ge.s32.totalorder %s36_s23, 2  ;;  %p163_p1 = scmp.ne.s32.totalorder %s4735_s17, %s4731_s16 }
   0x7   : > { %p164_p2 = scmp.eq.s32.totalorder %s3565_s21, 1  ;;  %p169_p3 = scmp.ne.s32.totalorder %s4731_s16, %s4727_s15 }
   0x8   : > { %s5462_s23 = smov (%p38_p0, %s36_s23), 0  ;;  %p170_p5 = scmp.eq.s32.totalorder %s3566_s22, 1 }
   0x9   : > { %p4818_p4 = por %p164_p2, %p163_p1  ;;  %s148_s26 = ssub.s32 %s4743_s19, %s5462_s23 }
   0xa   : > { %p3572_p6 = scmp.ge.s32.totalorder %s4747_s20, 1  ;;  %p151_p7 = scmp.eq.s32.totalorder %s148_s26, 0 }
   0xb   : > { %p4825_p8 = por %p170_p5, %p169_p3  ;;  %p227_p9 = scmp.lt.s32.totalorder %s4747_s20, 3 }
   0xc   : > { %s4831_s28 = scalar_select %p151_p7, %s4735_s17, %s153_s24  }
   0xd   : > { %p228_p10 = pnand %p3572_p6, %p227_p9 }
   0xe   : > { %v4459_v0 = vld [vmem:[%s5450_s1] sm:$0xff] (!%p228_p10)   ;;  %v4749_v1 = vmov (!%p228_p10), 0   ;;  %s3574_s5 = sshll.u32 (!%p228_p10), %s4739_s18, 7  ;;  %v4460_v2 = vld [vmem:[%s5450_s1 + $0x8] sm:$0xff] (!%p228_p10)   ;;  %v4461_v3 = vld [vmem:[%s5450_s1 + $0x10] sm:$0xff] (!%p228_p10)   ;;  %s269_s13 = sand.u32 (!%p228_p10), 1, %s4731_s16  }
   0xf   : > { %231 = sbr.rel (%p228_p10) target bundleno = 565 (0x235), region = 36  ;;  %1457 = vmatprep.subr.bf16.mxu0 (!%p228_p10), %v4749_v1  ;;  %4369 = vmatprep.subr.bf16.mxu1 (!%p228_p10), %v4749_v1  ;;  %p274_p11 = scmp.lt.s32.totalorder (!%p228_p10), %s3574_s5, 255  ;;  %v4462_v4 = vld [vmem:[%s5450_s1 + $0x18] sm:$0xff] (!%p228_p10)   ;;  %v4463_v5 = vld [vmem:[%s5450_s1 + $0x20] sm:$0xff] (!%p228_p10)   ;;  %v4464_v7 = vld [vmem:[%s5450_s1 + $0x28] sm:$0xff] (!%p228_p10)  }
  0x10   : > { %1458 = vmatpush1.bf16.msra.mxu0 (!%p228_p10), %v4459_v0  ;;  %4385 = vmatpush1.bf16.msra.mxu1 (!%p228_p10), %v4459_v0  ;;  %v4465_v9 = vld [vmem:[%s5450_s1 + $0x30] sm:$0xff] (!%p228_p10)   ;;  %v4466_v10 = vld [vmem:[%s5450_s1 + $0x38] sm:$0xff] (!%p228_p10)   ;;  %v4467_v11 = vld [vmem:[%s5450_s1 + $0x40] sm:$0xff] (!%p228_p10)   ;;  %s3573_s14 = sshll.u32 (!%p228_p10), %s269_s13, 9  ;;  %s3985_s30 = sshll.u32 (!%p228_p10), %s4739_s18, 13 }
  0x11   : > { %1459 = vmatprep.subr.bf16.mxu0 (!%p228_p10), %v4749_v1  ;;  %4370 = vmatprep.subr.bf16.mxu1 (!%p228_p10), %v4749_v1  ;;  %v4468_v12 = vld [vmem:[%s5450_s1 + $0x48] sm:$0xff] (!%p228_p10)   ;;  %v4469_v13 = vld [vmem:[%s5450_s1 + $0x50] sm:$0xff] (!%p228_p10)   ;;  %v4470_v14 = vld [vmem:[%s5450_s1 + $0x58] sm:$0xff] (!%p228_p10)   ;;  %s5060_s21 = scalar_lea.vmem (!%p228_p10), [#allocation3], %s3573_s14  ;;  %s5395_s8 = scalar_lea.hbm (!%p228_p10), %s5453_s4, %s3985_s30 }
  0x12   : > { %v4471_v15 = vld [vmem:[%s5450_s1 + $0x60] sm:$0xff] (!%p228_p10)   ;;  %v4472_v16 = vld [vmem:[%s5450_s1 + $0x68] sm:$0xff] (!%p228_p10)   ;;  %v4473_v17 = vld [vmem:[%s5450_s1 + $0x70] sm:$0xff] (!%p228_p10)   ;;  %s5403_s18 = scalar_lea.sflag (!%p228_p10), [#allocation4], %s269_s13  ;;  %s4750_s10 = smov (!%p228_p10), [#allocation3]  }
  0x13   : > { %v4474_v18 = vld [vmem:[%s5450_s1 + $0x78] sm:$0xff] (!%p228_p10)   ;;  %s4673_s11 = sshll.u32 (!%p228_p10), %s4750_s10, 4  ;;  %s4674_s11 = int_to_ptr.vmem [resolvable:$false] %s4673_s11 }
  0x14   : > { %1460 = vmatpush1.bf16.msra.mxu0 (!%p228_p10), %v4460_v2  ;;  %4386 = vmatpush1.bf16.msra.mxu1 (!%p228_p10), %v4460_v2 }
  0x15   : > { %1461 = vmatprep.subr.bf16.mxu0 (!%p228_p10), %v4749_v1  ;;  %4371 = vmatprep.subr.bf16.mxu1 (!%p228_p10), %v4749_v1 }
  0x16   : > { %s5464_s5 = smov (!%p274_p11, %s3574_s5), 255 }
  0x17   : > { %s3856_s12 = sshll.u32 %s5464_s5, 3  ;;  %s3442_s5 = sshll.u32 %s5060_s21, 4  ;;  %s5397_s5 = int_to_ptr.vmem [resolvable:$true] %s3442_s5 }
  0x18   : > { %1462 = vmatpush1.bf16.msra.mxu0 %v4461_v3  ;;  %4387 = vmatpush1.bf16.msra.mxu1 %v4461_v3  ;;  %s4860_s24 = scalar_lea.vmem %s5449_s0, %s3856_s12  ;;  %s4669_s9 = scalar_lea.vmem %s5397_s5, 8192 }
  0x19   : > { %1463 = vmatprep.subr.bf16.mxu0 %v4749_v1  ;;  %4372 = vmatprep.subr.bf16.mxu1 %v4749_v1  ;;  %v4477_v6 = vld [vmem:[%s4860_s24 + $0x4] ss:$8 sps:$4 sm:$0xff]   ;;  %v4475_v19 = vld [vmem:[%s4860_s24] ss:$8 sps:$4 sm:$0xff]   ;;  %v4481_v21 = vld [vmem:[%s4860_s24 + $0x14] ss:$8 sps:$4 sm:$0xff]   ;;  %p4670_p12 = scmp.ne.s32.totalorder %s5397_s5, %s4669_s9  ;;  %p4676_p1 = scmp.lt.s32.totalorder %s5397_s5, %s4674_s11 }
  0x1a   : > { %v4480_v8 = vld [vmem:[%s4860_s24 + $0x204] ss:$8 sps:$4 sm:$0xff]   ;;  %1489 = vmatprep.mubr.bf16.mxu0 %v4477_v6  ;;  %v4478_v20 = vld [vmem:[%s4860_s24 + $0x200] ss:$8 sps:$4 sm:$0xff]   ;;  %v4483_v22 = vld [vmem:[%s4860_s24 + $0x214] ss:$8 sps:$4 sm:$0xff]  }
  0x1b   : > { %1745 = vmatprep.mubr.bf16.mxu1 %v4480_v8  ;;  %v4485_v23 = vld [vmem:[%s4860_s24 + $0x10] ss:$8 sps:$4 sm:$0xff]   ;;  %v4487_v25 = vld [vmem:[%s4860_s24 + $0x24] ss:$8 sps:$4 sm:$0xff]   ;;  %v4491_v27 = vld [vmem:[%s4860_s24 + $0x20] ss:$8 sps:$4 sm:$0xff]   ;;  %p4671_p13 = pnand %p4670_p12, %p4818_p4 }
  0x1c   : > { %1464 = vmatpush1.bf16.msra.mxu0 %v4462_v4  ;;  %4388 = vmatpush1.bf16.msra.mxu1 %v4462_v4  ;;  %v4486_v24 = vld [vmem:[%s4860_s24 + $0x210] ss:$8 sps:$4 sm:$0xff]   ;;  %v4489_v26 = vld [vmem:[%s4860_s24 + $0x224] ss:$8 sps:$4 sm:$0xff]   ;;  %v4492_v28 = vld [vmem:[%s4860_s24 + $0x220] ss:$8 sps:$4 sm:$0xff]  }
  0x1d   : > { %1465 = vmatprep.subr.bf16.mxu0 %v4749_v1  ;;  %4373 = vmatprep.subr.bf16.mxu1 %v4749_v1  ;;  %v4493_v29 = vld [vmem:[%s4860_s24 + $0x34] ss:$8 sps:$4 sm:$0xff]   ;;  %v4497_v31 = vld [vmem:[%s4860_s24 + $0x30] ss:$8 sps:$4 sm:$0xff]   ;;  %v4499_v33 = vld [vmem:[%s4860_s24 + $0x44] ss:$8 sps:$4 sm:$0xff]   ;;  %p4672_p0 = pneg %p4671_p13 }
  0x1e   : > { %v4495_v30 = vld [vmem:[%s4860_s24 + $0x234] ss:$8 sps:$4 sm:$0xff]   ;;  %v4498_v32 = vld [vmem:[%s4860_s24 + $0x230] ss:$8 sps:$4 sm:$0xff]   ;;  %v4501_v34 = vld [vmem:[%s4860_s24 + $0x244] ss:$8 sps:$4 sm:$0xff]  }
  0x1f   : > { %v4503_v35 = vld [vmem:[%s4860_s24 + $0x40] ss:$8 sps:$4 sm:$0xff]   ;;  %v4505_v37 = vld [vmem:[%s4860_s24 + $0x54] ss:$8 sps:$4 sm:$0xff]   ;;  %v4509_v39 = vld [vmem:[%s4860_s24 + $0x50] ss:$8 sps:$4 sm:$0xff]  }
  0x20   : > { %1466 = vmatpush1.bf16.msra.mxu0 %v4463_v5  ;;  %4389 = vmatpush1.bf16.msra.mxu1 %v4463_v5  ;;  %v4504_v36 = vld [vmem:[%s4860_s24 + $0x240] ss:$8 sps:$4 sm:$0xff]   ;;  %v4507_v38 = vld [vmem:[%s4860_s24 + $0x254] ss:$8 sps:$4 sm:$0xff]   ;;  %v4510_v40 = vld [vmem:[%s4860_s24 + $0x250] ss:$8 sps:$4 sm:$0xff]  }
  0x21   : > { %1467 = vmatprep.subr.bf16.mxu0 %v4749_v1  ;;  %4374 = vmatprep.subr.bf16.mxu1 %v4749_v1  ;;  %v4511_v41 = vld [vmem:[%s4860_s24 + $0x64] ss:$8 sps:$4 sm:$0xff]   ;;  %v4515_v43 = vld [vmem:[%s4860_s24 + $0x60] ss:$8 sps:$4 sm:$0xff]   ;;  %v4517_v45 = vld [vmem:[%s4860_s24 + $0x74] ss:$8 sps:$4 sm:$0xff]  }
  0x22   : > { %v4513_v42 = vld [vmem:[%s4860_s24 + $0x264] ss:$8 sps:$4 sm:$0xff]   ;;  %v4516_v44 = vld [vmem:[%s4860_s24 + $0x260] ss:$8 sps:$4 sm:$0xff]   ;;  %v4519_v46 = vld [vmem:[%s4860_s24 + $0x274] ss:$8 sps:$4 sm:$0xff]  }
  0x23   : > { %v4521_v47 = vld [vmem:[%s4860_s24 + $0x70] ss:$8 sps:$4 sm:$0xff]   ;;  %v4523_v49 = vld [vmem:[%s4860_s24 + $0x84] ss:$8 sps:$4 sm:$0xff]   ;;  %v4527_v51 = vld [vmem:[%s4860_s24 + $0x80] ss:$8 sps:$4 sm:$0xff]  }
  0x24   : > { %1468 = vmatpush1.bf16.msra.mxu0 %v4464_v7  ;;  %4390 = vmatpush1.bf16.msra.mxu1 %v4464_v7  ;;  %v4522_v48 = vld [vmem:[%s4860_s24 + $0x270] ss:$8 sps:$4 sm:$0xff]   ;;  %v4525_v50 = vld [vmem:[%s4860_s24 + $0x284] ss:$8 sps:$4 sm:$0xff]   ;;  %v4528_v52 = vld [vmem:[%s4860_s24 + $0x280] ss:$8 sps:$4 sm:$0xff]  }
  0x25   : > { %1469 = vmatprep.subr.bf16.mxu0 %v4749_v1  ;;  %4375 = vmatprep.subr.bf16.mxu1 %v4749_v1  ;;  %v4529_v53 = vld [vmem:[%s4860_s24 + $0x94] ss:$8 sps:$4 sm:$0xff]   ;;  %v4533_v55 = vld [vmem:[%s4860_s24 + $0x90] ss:$8 sps:$4 sm:$0xff]   ;;  %v4535_v57 = vld [vmem:[%s4860_s24 + $0xa4] ss:$8 sps:$4 sm:$0xff]  }
  0x26   : > { %v4531_v54 = vld [vmem:[%s4860_s24 + $0x294] ss:$8 sps:$4 sm:$0xff]   ;;  %v4534_v56 = vld [vmem:[%s4860_s24 + $0x290] ss:$8 sps:$4 sm:$0xff]   ;;  %v4537_v58 = vld [vmem:[%s4860_s24 + $0x2a4] ss:$8 sps:$4 sm:$0xff]  }
  0x27   : > { %v4539_v59 = vld [vmem:[%s4860_s24 + $0xa0] ss:$8 sps:$4 sm:$0xff]   ;;  %v4541_v61 = vld [vmem:[%s4860_s24 + $0xb4] ss:$8 sps:$4 sm:$0xff]   ;;  %v4545_v63 = vld [vmem:[%s4860_s24 + $0xb0] ss:$8 sps:$4 sm:$0xff]  }
  0x28   : > { %1470 = vmatpush1.bf16.msra.mxu0 %v4465_v9  ;;  %4391 = vmatpush1.bf16.msra.mxu1 %v4465_v9  ;;  %v4540_v60 = vld [vmem:[%s4860_s24 + $0x2a0] ss:$8 sps:$4 sm:$0xff]   ;;  %v4543_v62 = vld [vmem:[%s4860_s24 + $0x2b4] ss:$8 sps:$4 sm:$0xff]   ;;  %v4546_v0 = vld [vmem:[%s4860_s24 + $0x2b0] ss:$8 sps:$4 sm:$0xff]  }
  0x29   : > { %1471 = vmatprep.subr.bf16.mxu0 %v4749_v1  ;;  %4376 = vmatprep.subr.bf16.mxu1 %v4749_v1  ;;  %v4549_v2 = vld [vmem:[%s4860_s24 + $0x2c4] ss:$8 sps:$4 sm:$0xff]   ;;  %v4551_v3 = vld [vmem:[%s4860_s24 + $0xc0] ss:$8 sps:$4 sm:$0xff]   ;;  %v4553_v5 = vld [vmem:[%s4860_s24 + $0xd4] ss:$8 sps:$4 sm:$0xff]  }
  0x2a   : > { %v4552_v4 = vld [vmem:[%s4860_s24 + $0x2c0] ss:$8 sps:$4 sm:$0xff]   ;;  %v4555_v6 = vld [vmem:[%s4860_s24 + $0x2d4] ss:$8 sps:$4 sm:$0xff]   ;;  %v4557_v7 = vld [vmem:[%s4860_s24 + $0xd0] ss:$8 sps:$4 sm:$0xff]  }
  0x2b   : > { %v4558_v8 = vld [vmem:[%s4860_s24 + $0x2d0] ss:$8 sps:$4 sm:$0xff]   ;;  %v4559_v9 = vld [vmem:[%s4860_s24 + $0xe4] ss:$8 sps:$4 sm:$0xff]   ;;  %s4675_s12 = scalar_lea.vmem %s4674_s11, 16384 }
  0x2c   : > { %1472 = vmatpush1.bf16.msra.mxu0 %v4466_v10  ;;  %4392 = vmatpush1.bf16.msra.mxu1 %v4466_v10  ;;  %v4561_v10 = vld [vmem:[%s4860_s24 + $0x2e4] ss:$8 sps:$4 sm:$0xff]   ;;  %p4677_p2 = scmp.lt.s32.totalorder %s4675_s12, %s4669_s9 }
  0x2d   : > { %1473 = vmatprep.subr.bf16.mxu0 %v4749_v1  ;;  %4377 = vmatprep.subr.bf16.mxu1 %v4749_v1 }
  0x2e   : > { %p4678_p3 = por %p4677_p2, %p4676_p1 }
  0x30   : > { %1474 = vmatpush1.bf16.msra.mxu0 %v4467_v11  ;;  %4393 = vmatpush1.bf16.msra.mxu1 %v4467_v11  ;;  %v4563_v11 = vld [vmem:[%s4860_s24 + $0xe0] ss:$8 sps:$4 sm:$0xff]   ;;  %p4679_p5 = pnand %p4678_p3, %p4672_p0 }
  0x31   : > { %1475 = vmatprep.subr.bf16.mxu0 %v4749_v1  ;;  %4378 = vmatprep.subr.bf16.mxu1 %v4749_v1 }
  0x34   : > { %1476 = vmatpush1.bf16.msra.mxu0 %v4468_v12  ;;  %4394 = vmatpush1.bf16.msra.mxu1 %v4468_v12  ;;  %v4564_v12 = vld [vmem:[%s4860_s24 + $0x2e0] ss:$8 sps:$4 sm:$0xff]  }
  0x35   : > { %1477 = vmatprep.subr.bf16.mxu0 %v4749_v1  ;;  %4379 = vmatprep.subr.bf16.mxu1 %v4749_v1 }
  0x38   : > { %1478 = vmatpush1.bf16.msra.mxu0 %v4469_v13  ;;  %4395 = vmatpush1.bf16.msra.mxu1 %v4469_v13  ;;  %v4565_v13 = vld [vmem:[%s4860_s24 + $0xf4] ss:$8 sps:$4 sm:$0xff]  }
  0x39   : > { %1479 = vmatprep.subr.bf16.mxu0 %v4749_v1  ;;  %4380 = vmatprep.subr.bf16.mxu1 %v4749_v1 }
  0x3c   : > { %1480 = vmatpush1.bf16.msra.mxu0 %v4470_v14  ;;  %4396 = vmatpush1.bf16.msra.mxu1 %v4470_v14  ;;  %v4567_v14 = vld [vmem:[%s4860_s24 + $0x2f4] ss:$8 sps:$4 sm:$0xff]  }
  0x3d   : > { %1481 = vmatprep.subr.bf16.mxu0 %v4749_v1  ;;  %4381 = vmatprep.subr.bf16.mxu1 %v4749_v1 }
  0x40   : > { %1482 = vmatpush1.bf16.msra.mxu0 %v4471_v15  ;;  %4397 = vmatpush1.bf16.msra.mxu1 %v4471_v15  ;;  %v4569_v15 = vld [vmem:[%s4860_s24 + $0xf0] ss:$8 sps:$4 sm:$0xff]  }
  0x41   : > { %1483 = vmatprep.subr.bf16.mxu0 %v4749_v1  ;;  %4382 = vmatprep.subr.bf16.mxu1 %v4749_v1 }
  0x44   : > { %1484 = vmatpush1.bf16.msra.mxu0 %v4472_v16  ;;  %4398 = vmatpush1.bf16.msra.mxu1 %v4472_v16  ;;  %v4570_v16 = vld [vmem:[%s4860_s24 + $0x2f0] ss:$8 sps:$4 sm:$0xff]  }
  0x45   : > { %1485 = vmatprep.subr.bf16.mxu0 %v4749_v1  ;;  %4383 = vmatprep.subr.bf16.mxu1 %v4749_v1 }
  0x48   : > { %1486 = vmatpush1.bf16.msra.mxu0 %v4473_v17  ;;  %4399 = vmatpush1.bf16.msra.mxu1 %v4473_v17  ;;  %v4571_v17 = vld [vmem:[%s4860_s24 + $0x104] ss:$8 sps:$4 sm:$0xff]  }
  0x49   : > { %1487 = vmatprep.subr.bf16.mxu0 %v4749_v1  ;;  %4384 = vmatprep.subr.bf16.mxu1 %v4749_v1  ;;  %v4547_v1 = vld [vmem:[%s4860_s24 + $0xc4] ss:$8 sps:$4 sm:$0xff]  }
  0x4c   : > { %1488 = vmatpush1.bf16.msra.mxu0 %v4474_v18  ;;  %4400 = vmatpush1.bf16.msra.mxu1 %v4474_v18  ;;  %v4573_v18 = vld [vmem:[%s4860_s24 + $0x304] ss:$8 sps:$4 sm:$0xff]  }
  0x4f   : > { %1490 = vmatmul.mubr.bf16.vlgmr.msra.gmra.mrb[0].mxu0 %v4475_v19  ;;  %1746 = vmatmul.mubr.bf16.vlgmr.msra.gmra.mrb[0].mxu1 %v4478_v20  ;;  %v4575_v19 = vld [vmem:[%s4860_s24 + $0x100] ss:$8 sps:$4 sm:$0xff]  }
  0x50   : > { %1497 = vmatprep.mubr.bf16.mxu0 %v4481_v21  ;;  %1753 = vmatprep.mubr.bf16.mxu1 %v4483_v22  ;;  %v4576_v20 = vld [vmem:[%s4860_s24 + $0x300] ss:$8 sps:$4 sm:$0xff]   ;;  %v4577_v21 = vld [vmem:[%s4860_s24 + $0x114] ss:$8 sps:$4 sm:$0xff]  }
  0x51   : > { %v4579_v22 = vld [vmem:[%s4860_s24 + $0x314] ss:$8 sps:$4 sm:$0xff]  }
  0x57   : > { %1498 = vmatmul.mubr.bf16.gmra.mrb[4].mxu0 %v4485_v23  ;;  %1754 = vmatmul.mubr.bf16.gmra.mrb[4].mxu1 %v4486_v24  ;;  %v4581_v23 = vld [vmem:[%s4860_s24 + $0x110] ss:$8 sps:$4 sm:$0xff]  }
  0x58   : > { %1505 = vmatprep.mubr.bf16.mxu0 %v4487_v25  ;;  %1761 = vmatprep.mubr.bf16.mxu1 %v4489_v26  ;;  %v4582_v24 = vld [vmem:[%s4860_s24 + $0x310] ss:$8 sps:$4 sm:$0xff]   ;;  %v4583_v25 = vld [vmem:[%s4860_s24 + $0x124] ss:$8 sps:$4 sm:$0xff]  }
  0x59   : > { %v4585_v26 = vld [vmem:[%s4860_s24 + $0x324] ss:$8 sps:$4 sm:$0xff]  }
  0x5f   : > { %1506 = vmatmul.mubr.bf16.gmra.mrb[8].mxu0 %v4491_v27  ;;  %1762 = vmatmul.mubr.bf16.gmra.mrb[8].mxu1 %v4492_v28  ;;  %v4587_v27 = vld [vmem:[%s4860_s24 + $0x120] ss:$8 sps:$4 sm:$0xff]  }
  0x60   : > { %1513 = vmatprep.mubr.bf16.mxu0 %v4493_v29  ;;  %1769 = vmatprep.mubr.bf16.mxu1 %v4495_v30  ;;  %v4588_v28 = vld [vmem:[%s4860_s24 + $0x320] ss:$8 sps:$4 sm:$0xff]   ;;  %v4589_v29 = vld [vmem:[%s4860_s24 + $0x134] ss:$8 sps:$4 sm:$0xff]  }
  0x61   : > { %v4591_v30 = vld [vmem:[%s4860_s24 + $0x334] ss:$8 sps:$4 sm:$0xff]  }
  0x67   : > { %1514 = vmatmul.mubr.bf16.gmra.mrb[12].mxu0 %v4497_v31  ;;  %1770 = vmatmul.mubr.bf16.gmra.mrb[12].mxu1 %v4498_v32  ;;  %v4593_v31 = vld [vmem:[%s4860_s24 + $0x130] ss:$8 sps:$4 sm:$0xff]  }
  0x68   : > { %1521 = vmatprep.mubr.bf16.mxu0 %v4499_v33  ;;  %1777 = vmatprep.mubr.bf16.mxu1 %v4501_v34  ;;  %v4594_v32 = vld [vmem:[%s4860_s24 + $0x330] ss:$8 sps:$4 sm:$0xff]   ;;  %v4595_v33 = vld [vmem:[%s4860_s24 + $0x144] ss:$8 sps:$4 sm:$0xff]  }
  0x69   : > { %v4597_v34 = vld [vmem:[%s4860_s24 + $0x344] ss:$8 sps:$4 sm:$0xff]  }
  0x6f   : > { %1522 = vmatmul.mubr.bf16.gmra.mrb[16].mxu0 %v4503_v35  ;;  %1778 = vmatmul.mubr.bf16.gmra.mrb[16].mxu1 %v4504_v36  ;;  %v4599_v35 = vld [vmem:[%s4860_s24 + $0x140] ss:$8 sps:$4 sm:$0xff]  }
  0x70   : > { %1529 = vmatprep.mubr.bf16.mxu0 %v4505_v37  ;;  %1785 = vmatprep.mubr.bf16.mxu1 %v4507_v38  ;;  %v4600_v36 = vld [vmem:[%s4860_s24 + $0x340] ss:$8 sps:$4 sm:$0xff]   ;;  %v4601_v37 = vld [vmem:[%s4860_s24 + $0x154] ss:$8 sps:$4 sm:$0xff]  }
  0x71   : > { %v4603_v38 = vld [vmem:[%s4860_s24 + $0x354] ss:$8 sps:$4 sm:$0xff]  }
  0x77   : > { %1530 = vmatmul.mubr.bf16.gmra.mrb[20].mxu0 %v4509_v39  ;;  %1786 = vmatmul.mubr.bf16.gmra.mrb[20].mxu1 %v4510_v40  ;;  %v4605_v39 = vld [vmem:[%s4860_s24 + $0x150] ss:$8 sps:$4 sm:$0xff]  }
  0x78   : > { %1537 = vmatprep.mubr.bf16.mxu0 %v4511_v41  ;;  %1793 = vmatprep.mubr.bf16.mxu1 %v4513_v42  ;;  %v4606_v40 = vld [vmem:[%s4860_s24 + $0x350] ss:$8 sps:$4 sm:$0xff]   ;;  %v4607_v41 = vld [vmem:[%s4860_s24 + $0x164] ss:$8 sps:$4 sm:$0xff]  }
  0x79   : > { %v4609_v42 = vld [vmem:[%s4860_s24 + $0x364] ss:$8 sps:$4 sm:$0xff]  }
  0x7f   : > { %1538 = vmatmul.mubr.bf16.gmra.mrb[24].mxu0 %v4515_v43  ;;  %1794 = vmatmul.mubr.bf16.gmra.mrb[24].mxu1 %v4516_v44  ;;  %v4611_v43 = vld [vmem:[%s4860_s24 + $0x160] ss:$8 sps:$4 sm:$0xff]  }
  0x80   : > { %1545 = vmatprep.mubr.bf16.mxu0 %v4517_v45  ;;  %1801 = vmatprep.mubr.bf16.mxu1 %v4519_v46  ;;  %v4612_v44 = vld [vmem:[%s4860_s24 + $0x360] ss:$8 sps:$4 sm:$0xff]   ;;  %v4613_v45 = vld [vmem:[%s4860_s24 + $0x174] ss:$8 sps:$4 sm:$0xff]  }
  0x81   : > { %v4615_v46 = vld [vmem:[%s4860_s24 + $0x374] ss:$8 sps:$4 sm:$0xff]  }
  0x87   : > { %1546 = vmatmul.mubr.bf16.gmra.mrb[28].mxu0 %v4521_v47  ;;  %1802 = vmatmul.mubr.bf16.gmra.mrb[28].mxu1 %v4522_v48  ;;  %v4617_v47 = vld [vmem:[%s4860_s24 + $0x170] ss:$8 sps:$4 sm:$0xff]  }
  0x88   : > { %1553 = vmatprep.mubr.bf16.mxu0 %v4523_v49  ;;  %1809 = vmatprep.mubr.bf16.mxu1 %v4525_v50  ;;  %v4618_v48 = vld [vmem:[%s4860_s24 + $0x370] ss:$8 sps:$4 sm:$0xff]   ;;  %v4619_v49 = vld [vmem:[%s4860_s24 + $0x184] ss:$8 sps:$4 sm:$0xff]  }
  0x89   : > { %v4621_v50 = vld [vmem:[%s4860_s24 + $0x384] ss:$8 sps:$4 sm:$0xff]  }
  0x8f   : > { %1554 = vmatmul.mubr.bf16.gmra.mrb[32].mxu0 %v4527_v51  ;;  %1810 = vmatmul.mubr.bf16.gmra.mrb[32].mxu1 %v4528_v52  ;;  %v4623_v51 = vld [vmem:[%s4860_s24 + $0x180] ss:$8 sps:$4 sm:$0xff]  }
  0x90   : > { %1561 = vmatprep.mubr.bf16.mxu0 %v4529_v53  ;;  %1817 = vmatprep.mubr.bf16.mxu1 %v4531_v54  ;;  %v4624_v52 = vld [vmem:[%s4860_s24 + $0x380] ss:$8 sps:$4 sm:$0xff]   ;;  %v4625_v53 = vld [vmem:[%s4860_s24 + $0x194] ss:$8 sps:$4 sm:$0xff]  }
  0x91   : > { %v4627_v54 = vld [vmem:[%s4860_s24 + $0x394] ss:$8 sps:$4 sm:$0xff]  }
  0x97   : > { %1562 = vmatmul.mubr.bf16.gmra.mrb[36].mxu0 %v4533_v55  ;;  %1818 = vmatmul.mubr.bf16.gmra.mrb[36].mxu1 %v4534_v56  ;;  %v4629_v55 = vld [vmem:[%s4860_s24 + $0x190] ss:$8 sps:$4 sm:$0xff]  }
  0x98   : > { %1569 = vmatprep.mubr.bf16.mxu0 %v4535_v57  ;;  %1825 = vmatprep.mubr.bf16.mxu1 %v4537_v58  ;;  %v4630_v56 = vld [vmem:[%s4860_s24 + $0x390] ss:$8 sps:$4 sm:$0xff]   ;;  %v4631_v57 = vld [vmem:[%s4860_s24 + $0x1a4] ss:$8 sps:$4 sm:$0xff]  }
  0x99   : > { %v4633_v58 = vld [vmem:[%s4860_s24 + $0x3a4] ss:$8 sps:$4 sm:$0xff]  }
  0x9f   : > { %1570 = vmatmul.mubr.bf16.gmra.mrb[40].mxu0 %v4539_v59  ;;  %1826 = vmatmul.mubr.bf16.gmra.mrb[40].mxu1 %v4540_v60  ;;  %v4635_v59 = vld [vmem:[%s4860_s24 + $0x1a0] ss:$8 sps:$4 sm:$0xff]  }
  0xa0   : > { %1577 = vmatprep.mubr.bf16.mxu0 %v4541_v61  ;;  %1833 = vmatprep.mubr.bf16.mxu1 %v4543_v62  ;;  %v4636_v60 = vld [vmem:[%s4860_s24 + $0x3a0] ss:$8 sps:$4 sm:$0xff]   ;;  %v4637_v61 = vld [vmem:[%s4860_s24 + $0x1b4] ss:$8 sps:$4 sm:$0xff]  }
  0xa1   : > { %v4639_v62 = vld [vmem:[%s4860_s24 + $0x3b4] ss:$8 sps:$4 sm:$0xff]  }
  0xa7   : > { %1578 = vmatmul.mubr.bf16.gmra.mrb[44].mxu0 %v4545_v63  ;;  %1834 = vmatmul.mubr.bf16.gmra.mrb[44].mxu1 %v4546_v0  ;;  %v5032_v63 = vld [vmem:[%s5451_s2] ss:$0 sm:$0xff] }
  0xa8   : > { %1585 = vmatprep.mubr.bf16.mxu0 %v4547_v1  ;;  %1841 = vmatprep.mubr.bf16.mxu1 %v4549_v2  ;;  %v5037_v1 = vld [vmem:[%s5452_s3] ss:$0 sm:$0xff] }
  0xaf   : > { %1586 = vmatmul.mubr.bf16.gmra.mrb[48].mxu0 %v4551_v3  ;;  %1842 = vmatmul.mubr.bf16.gmra.mrb[48].mxu1 %v4552_v4  ;;  %v4641_v3 = vld [vmem:[%s4860_s24 + $0x1b0] ss:$8 sps:$4 sm:$0xff]  }
  0xb0   : > { %1593 = vmatprep.mubr.bf16.mxu0 %v4553_v5  ;;  %1849 = vmatprep.mubr.bf16.mxu1 %v4555_v6 }
  0xb7   : > { %1594 = vmatmul.mubr.bf16.gmra.mrb[52].mxu0 %v4557_v7  ;;  %1850 = vmatmul.mubr.bf16.gmra.mrb[52].mxu1 %v4558_v8  ;;  %v4642_v8 = vld [vmem:[%s4860_s24 + $0x3b0] ss:$8 sps:$4 sm:$0xff]  }
  0xb8   : > { %1601 = vmatprep.mubr.bf16.mxu0 %v4559_v9  ;;  %1857 = vmatprep.mubr.bf16.mxu1 %v4561_v10 }
  0xbf   : > { %1602 = vmatmul.mubr.bf16.gmra.mrb[56].mxu0 %v4563_v11  ;;  %1858 = vmatmul.mubr.bf16.gmra.mrb[56].mxu1 %v4564_v12  ;;  %v4643_v11 = vld [vmem:[%s4860_s24 + $0x1c4] ss:$8 sps:$4 sm:$0xff]  }
  0xc0   : > { %1609 = vmatprep.mubr.bf16.mxu0 %v4565_v13  ;;  %1865 = vmatprep.mubr.bf16.mxu1 %v4567_v14  ;;  %v4645_v12 = vld [vmem:[%s4860_s24 + $0x3c4] ss:$8 sps:$4 sm:$0xff]  }
  0xc7   : > { %1610 = vmatmul.mubr.bf16.gmra.mrb[60].mxu0 %v4569_v15  ;;  %1866 = vmatmul.mubr.bf16.gmra.mrb[60].mxu1 %v4570_v16 }
  0xc8   : > { %1617 = vmatprep.mubr.bf16.mxu0 %v4571_v17  ;;  %1873 = vmatprep.mubr.bf16.mxu1 %v4573_v18 }
  0xcf   : > { %1618 = vmatmul.mubr.bf16.gmra.mrb[64].mxu0 %v4575_v19  ;;  %1874 = vmatmul.mubr.bf16.gmra.mrb[64].mxu1 %v4576_v20 }
  0xd0   : > { %1625 = vmatprep.mubr.bf16.mxu0 %v4577_v21  ;;  %1881 = vmatprep.mubr.bf16.mxu1 %v4579_v22 }
  0xd7   : > { %1626 = vmatmul.mubr.bf16.gmra.mrb[68].mxu0 %v4581_v23  ;;  %1882 = vmatmul.mubr.bf16.gmra.mrb[68].mxu1 %v4582_v24 }
  0xd8   : > { %1633 = vmatprep.mubr.bf16.mxu0 %v4583_v25  ;;  %1889 = vmatprep.mubr.bf16.mxu1 %v4585_v26 }
  0xdf   : > { %1634 = vmatmul.mubr.bf16.gmra.mrb[72].mxu0 %v4587_v27  ;;  %1890 = vmatmul.mubr.bf16.gmra.mrb[72].mxu1 %v4588_v28 }
  0xe0   : > { %1641 = vmatprep.mubr.bf16.mxu0 %v4589_v29  ;;  %1897 = vmatprep.mubr.bf16.mxu1 %v4591_v30 }
  0xe7   : > { %1642 = vmatmul.mubr.bf16.gmra.mrb[76].mxu0 %v4593_v31  ;;  %1898 = vmatmul.mubr.bf16.gmra.mrb[76].mxu1 %v4594_v32 }
  0xe8   : > { %1649 = vmatprep.mubr.bf16.mxu0 %v4595_v33  ;;  %1905 = vmatprep.mubr.bf16.mxu1 %v4597_v34  ;;  %v4647_v33 = vld [vmem:[%s4860_s24 + $0x1c0] ss:$8 sps:$4 sm:$0xff]  }
  0xe9   : > { %v4648_v34 = vld [vmem:[%s4860_s24 + $0x3c0] ss:$8 sps:$4 sm:$0xff]  }
  0xef   : > { %1650 = vmatmul.mubr.bf16.gmra.mrb[80].mxu0 %v4599_v35  ;;  %1906 = vmatmul.mubr.bf16.gmra.mrb[80].mxu1 %v4600_v36 }
  0xf0   : > { %1657 = vmatprep.mubr.bf16.mxu0 %v4601_v37  ;;  %1913 = vmatprep.mubr.bf16.mxu1 %v4603_v38  ;;  %v4649_v37 = vld [vmem:[%s4860_s24 + $0x1d4] ss:$8 sps:$4 sm:$0xff]  }
  0xf1   : > { %v4651_v38 = vld [vmem:[%s4860_s24 + $0x3d4] ss:$8 sps:$4 sm:$0xff]  }
  0xf7   : > { %1658 = vmatmul.mubr.bf16.gmra.mrb[84].mxu0 %v4605_v39  ;;  %1914 = vmatmul.mubr.bf16.gmra.mrb[84].mxu1 %v4606_v40 }
  0xf8   : > { %1665 = vmatprep.mubr.bf16.mxu0 %v4607_v41  ;;  %1921 = vmatprep.mubr.bf16.mxu1 %v4609_v42 }
  0xff   : > { %1666 = vmatmul.mubr.bf16.gmra.mrb[88].mxu0 %v4611_v43  ;;  %1922 = vmatmul.mubr.bf16.gmra.mrb[88].mxu1 %v4612_v44 }
 0x100   : > { %1673 = vmatprep.mubr.bf16.mxu0 %v4613_v45  ;;  %1929 = vmatprep.mubr.bf16.mxu1 %v4615_v46 }
 0x107   : > { %1674 = vmatmul.mubr.bf16.gmra.mrb[92].mxu0 %v4617_v47  ;;  %1930 = vmatmul.mubr.bf16.gmra.mrb[92].mxu1 %v4618_v48 }
 0x108   : > { %1681 = vmatprep.mubr.bf16.mxu0 %v4619_v49  ;;  %1937 = vmatprep.mubr.bf16.mxu1 %v4621_v50 }
 0x10f   : > { %1682 = vmatmul.mubr.bf16.gmra.mrb[96].mxu0 %v4623_v51  ;;  %1938 = vmatmul.mubr.bf16.gmra.mrb[96].mxu1 %v4624_v52 }
 0x110   : > { %1689 = vmatprep.mubr.bf16.mxu0 %v4625_v53  ;;  %1945 = vmatprep.mubr.bf16.mxu1 %v4627_v54 }
 0x117   : > { %1690 = vmatmul.mubr.bf16.gmra.mrb[100].mxu0 %v4629_v55  ;;  %1946 = vmatmul.mubr.bf16.gmra.mrb[100].mxu1 %v4630_v56 }
 0x118   : > { %1697 = vmatprep.mubr.bf16.mxu0 %v4631_v57  ;;  %1953 = vmatprep.mubr.bf16.mxu1 %v4633_v58 }
 0x11f   : > { %1698 = vmatmul.mubr.bf16.gmra.mrb[104].mxu0 %v4635_v59  ;;  %1954 = vmatmul.mubr.bf16.gmra.mrb[104].mxu1 %v4636_v60  ;;  %v4653_v59 = vld [vmem:[%s4860_s24 + $0x1d0] ss:$8 sps:$4 sm:$0xff]  }
 0x120   : > { %1705 = vmatprep.mubr.bf16.mxu0 %v4637_v61  ;;  %1961 = vmatprep.mubr.bf16.mxu1 %v4639_v62  ;;  %v4654_v60 = vld [vmem:[%s4860_s24 + $0x3d0] ss:$8 sps:$4 sm:$0xff]  }
 0x122   : > { %v1491_v0 = vpop.f32.mrb[0].mxu0  ;;  %v1747_v2 = vpop.f32.mrb[0].mxu1 }
 0x123   : > { %v2396_v4 = vmul.f32 %v5032_v63, %v1491_v0  ;;  %v2460_v5 = vmul.f32 %v5032_v63, %v1747_v2  ;;  %v1493_v6 = vpop.f32.mrb[1].mxu0  ;;  %v1749_v7 = vpop.f32.mrb[1].mxu1  ;;  %v4655_v0 = vld [vmem:[%s4860_s24 + $0x1e4] ss:$8 sps:$4 sm:$0xff]  }
 0x124   : > { %v1494_v9 = vpop.f32.mrb[2].mxu0  ;;  %v1750_v10 = vpop.f32.mrb[2].mxu1  ;;  %v4657_v2 = vld [vmem:[%s4860_s24 + $0x3e4] ss:$8 sps:$4 sm:$0xff]  }
 0x125   : > { %v2531_v13 = vadd.f32 %v5037_v1, %v2396_v4  ;;  %v2595_v14 = vadd.f32 %v5037_v1, %v2460_v5  ;;  %v2397_v15 = vmul.f32 %v5032_v63, %v1494_v9  ;;  %v2461_v16 = vmul.f32 %v5032_v63, %v1750_v10  ;;  %v1496_v17 = vpop.f32.mrb[3].mxu0  ;;  %v1752_v18 = vpop.f32.mrb[3].mxu1 }
 0x127   : > { %v2532_v19 = vadd.f32 %v5037_v1, %v2397_v15  ;;  %v2596_v20 = vadd.f32 %v5037_v1, %v2461_v16  ;;  %1706 = vmatmul.mubr.bf16.gmra.mrb[108].mxu0 %v4641_v3  ;;  %1962 = vmatmul.mubr.bf16.gmra.mrb[108].mxu1 %v4642_v8  ;;  %v2659_v21 = vmax.f32 %v2531_v13, 0.0  ;;  %v2723_v22 = vmax.f32 %v2595_v14, 0.0 }
 0x128   : > { %1713 = vmatprep.mubr.bf16.mxu0 %v4643_v11  ;;  %1969 = vmatprep.mubr.bf16.mxu1 %v4645_v12 }
 0x129   : > { %v2660_v23 = vmax.f32 %v2532_v19, 0.0  ;;  %v2724_v24 = vmax.f32 %v2596_v20, 0.0 }
 0x12a   : > { %v1499_v25 = vpop.f32.mrb[4].mxu0  ;;  %v1755_v26 = vpop.f32.mrb[4].mxu1 }
 0x12b   : > { %v3989_v27 = vpack.c.bf16 %v2660_v23, %v2659_v21  ;;  %v4149_v28 = vpack.c.bf16 %v2724_v24, %v2723_v22  ;;  %v2398_v29 = vmul.f32 %v5032_v63, %v1499_v25  ;;  %v2462_v30 = vmul.f32 %v5032_v63, %v1755_v26  ;;  %v1501_v31 = vpop.f32.mrb[5].mxu0  ;;  %v1757_v32 = vpop.f32.mrb[5].mxu1  ;;  %v4659_v23 = vld [vmem:[%s4860_s24 + $0x1e0] ss:$8 sps:$4 sm:$0xff]  }
 0x12c   : > { %v1502_v35 = vpop.f32.mrb[6].mxu0  ;;  %v1758_v36 = vpop.f32.mrb[6].mxu1  ;;  %v4660_v24 = vld [vmem:[%s4860_s24 + $0x3e0] ss:$8 sps:$4 sm:$0xff]  }
 0x12d   : > { %3990 = vst [vmem:[%s5060_s21] sm:$0xff] %v3989_v27   ;;  %4337 = vst [vmem:[%s5060_s21 + $0x100] sm:$0xff] %v4149_v28   ;;  %v2533_v39 = vadd.f32 %v5037_v1, %v2398_v29  ;;  %v2597_v40 = vadd.f32 %v5037_v1, %v2462_v30  ;;  %v2399_v41 = vmul.f32 %v5032_v63, %v1502_v35  ;;  %v1504_v43 = vpop.f32.mrb[7].mxu0  ;;  %v1760_v44 = vpop.f32.mrb[7].mxu1  ;;  %v4661_v27 = vld [vmem:[%s4860_s24 + $0x1f4] ss:$8 sps:$4 sm:$0xff]  }
 0x12e   : > { %v2463_v42 = vmul.f32 %v5032_v63, %v1758_v36  ;;  %v4663_v28 = vld [vmem:[%s4860_s24 + $0x3f4] ss:$8 sps:$4 sm:$0xff]  }
 0x12f   : > { %v2534_v45 = vadd.f32 %v5037_v1, %v2399_v41  ;;  %1714 = vmatmul.mubr.bf16.gmra.mrb[112].mxu0 %v4647_v33  ;;  %1970 = vmatmul.mubr.bf16.gmra.mrb[112].mxu1 %v4648_v34  ;;  %v2661_v47 = vmax.f32 %v2533_v39, 0.0  ;;  %v2725_v48 = vmax.f32 %v2597_v40, 0.0 }
 0x130   : > { %v2598_v46 = vadd.f32 %v5037_v1, %v2463_v42  ;;  %1721 = vmatprep.mubr.bf16.mxu0 %v4649_v37  ;;  %1977 = vmatprep.mubr.bf16.mxu1 %v4651_v38 }
 0x131   : > { %v2662_v49 = vmax.f32 %v2534_v45, 0.0 }
 0x132   : > { %v2726_v50 = vmax.f32 %v2598_v46, 0.0  ;;  %v1507_v51 = vpop.f32.mrb[8].mxu0  ;;  %v1763_v52 = vpop.f32.mrb[8].mxu1 }
 0x133   : > { %v3994_v53 = vpack.c.bf16 %v2662_v49, %v2661_v47  ;;  %v2400_v55 = vmul.f32 %v5032_v63, %v1507_v51  ;;  %v2464_v56 = vmul.f32 %v5032_v63, %v1763_v52  ;;  %v1509_v57 = vpop.f32.mrb[9].mxu0  ;;  %v1765_v58 = vpop.f32.mrb[9].mxu1  ;;  %v4665_v49 = vld [vmem:[%s4860_s24 + $0x1f0] ss:$8 sps:$4 sm:$0xff]  }
 0x134   : > { %v4154_v54 = vpack.c.bf16 %v2726_v50, %v2725_v48  ;;  %v1510_v61 = vpop.f32.mrb[10].mxu0  ;;  %v1766_v62 = vpop.f32.mrb[10].mxu1  ;;  %v4666_v50 = vld [vmem:[%s4860_s24 + $0x3f0] ss:$8 sps:$4 sm:$0xff]  }
 0x135   : > { %4306 = vst [vmem:[%s5060_s21 + $0x8] sm:$0xff] %v3994_v53   ;;  %v2535_v3 = vadd.f32 %v5037_v1, %v2400_v55  ;;  %v2599_v4 = vadd.f32 %v5037_v1, %v2464_v56  ;;  %v2401_v5 = vmul.f32 %v5032_v63, %v1510_v61  ;;  %v2465_v6 = vmul.f32 %v5032_v63, %v1766_v62  ;;  %v1512_v7 = vpop.f32.mrb[11].mxu0  ;;  %v1768_v8 = vpop.f32.mrb[11].mxu1 }
 0x136   : > { %4338 = vst [vmem:[%s5060_s21 + $0x108] sm:$0xff] %v4154_v54  }
 0x137   : > { %v2536_v9 = vadd.f32 %v5037_v1, %v2401_v5  ;;  %v2600_v10 = vadd.f32 %v5037_v1, %v2465_v6  ;;  %1722 = vmatmul.mubr.bf16.gmra.mrb[116].mxu0 %v4653_v59  ;;  %1978 = vmatmul.mubr.bf16.gmra.mrb[116].mxu1 %v4654_v60  ;;  %v2663_v11 = vmax.f32 %v2535_v3, 0.0  ;;  %v2727_v12 = vmax.f32 %v2599_v4, 0.0 }
 0x138   : > { %1729 = vmatprep.mubr.bf16.mxu0 %v4655_v0  ;;  %1985 = vmatprep.mubr.bf16.mxu1 %v4657_v2 }
 0x139   : > { %v2664_v13 = vmax.f32 %v2536_v9, 0.0  ;;  %v2728_v14 = vmax.f32 %v2600_v10, 0.0 }
 0x13a   : > { %v1515_v15 = vpop.f32.mrb[12].mxu0  ;;  %v1771_v16 = vpop.f32.mrb[12].mxu1 }
 0x13b   : > { %v3999_v17 = vpack.c.bf16 %v2664_v13, %v2663_v11  ;;  %v4159_v18 = vpack.c.bf16 %v2728_v14, %v2727_v12  ;;  %v2402_v19 = vmul.f32 %v5032_v63, %v1515_v15  ;;  %v2466_v20 = vmul.f32 %v5032_v63, %v1771_v16  ;;  %v1517_v21 = vpop.f32.mrb[13].mxu0  ;;  %v1773_v22 = vpop.f32.mrb[13].mxu1 }
 0x13c   : > { %v1518_v25 = vpop.f32.mrb[14].mxu0  ;;  %v1774_v26 = vpop.f32.mrb[14].mxu1 }
 0x13d   : > { %4307 = vst [vmem:[%s5060_s21 + $0x10] sm:$0xff] %v3999_v17   ;;  %4339 = vst [vmem:[%s5060_s21 + $0x110] sm:$0xff] %v4159_v18   ;;  %v2537_v29 = vadd.f32 %v5037_v1, %v2402_v19  ;;  %v2601_v30 = vadd.f32 %v5037_v1, %v2466_v20  ;;  %v2403_v31 = vmul.f32 %v5032_v63, %v1518_v25  ;;  %v1520_v33 = vpop.f32.mrb[15].mxu0  ;;  %v1776_v34 = vpop.f32.mrb[15].mxu1 }
 0x13e   : > { %v2467_v32 = vmul.f32 %v5032_v63, %v1774_v26 }
 0x13f   : > { %v2538_v35 = vadd.f32 %v5037_v1, %v2403_v31  ;;  %1730 = vmatmul.mubr.bf16.gmra.mrb[120].mxu0 %v4659_v23  ;;  %1986 = vmatmul.mubr.bf16.gmra.mrb[120].mxu1 %v4660_v24  ;;  %v2665_v37 = vmax.f32 %v2537_v29, 0.0  ;;  %v2729_v38 = vmax.f32 %v2601_v30, 0.0 }
 0x140   : > { %v2602_v36 = vadd.f32 %v5037_v1, %v2467_v32  ;;  %1737 = vmatprep.mubr.bf16.mxu0 %v4661_v27  ;;  %1993 = vmatprep.mubr.bf16.mxu1 %v4663_v28 }
 0x141   : > { %v2666_v39 = vmax.f32 %v2538_v35, 0.0 }
 0x142   : > { %v2730_v40 = vmax.f32 %v2602_v36, 0.0  ;;  %v1523_v41 = vpop.f32.mrb[16].mxu0  ;;  %v1779_v42 = vpop.f32.mrb[16].mxu1 }
 0x143   : > { %v4004_v43 = vpack.c.bf16 %v2666_v39, %v2665_v37  ;;  %v2404_v45 = vmul.f32 %v5032_v63, %v1523_v41  ;;  %v2468_v46 = vmul.f32 %v5032_v63, %v1779_v42  ;;  %v1525_v47 = vpop.f32.mrb[17].mxu0  ;;  %v1781_v48 = vpop.f32.mrb[17].mxu1 }
 0x144   : > { %v4164_v44 = vpack.c.bf16 %v2730_v40, %v2729_v38  ;;  %v1526_v51 = vpop.f32.mrb[18].mxu0  ;;  %v1782_v52 = vpop.f32.mrb[18].mxu1 }
 0x145   : > { %4308 = vst [vmem:[%s5060_s21 + $0x18] sm:$0xff] %v4004_v43   ;;  %v2539_v53 = vadd.f32 %v5037_v1, %v2404_v45  ;;  %v2603_v54 = vadd.f32 %v5037_v1, %v2468_v46  ;;  %v2405_v55 = vmul.f32 %v5032_v63, %v1526_v51  ;;  %v2469_v56 = vmul.f32 %v5032_v63, %v1782_v52  ;;  %v1528_v57 = vpop.f32.mrb[19].mxu0  ;;  %v1784_v58 = vpop.f32.mrb[19].mxu1 }
 0x146   : > { %4340 = vst [vmem:[%s5060_s21 + $0x118] sm:$0xff] %v4164_v44  }
 0x147   : > { %v2540_v59 = vadd.f32 %v5037_v1, %v2405_v55  ;;  %v2604_v60 = vadd.f32 %v5037_v1, %v2469_v56  ;;  %1738 = vmatmul.mubr.bf16.gmra.mrb[124].mxu0 %v4665_v49  ;;  %1994 = vmatmul.mubr.bf16.gmra.mrb[124].mxu1 %v4666_v50  ;;  %v2667_v61 = vmax.f32 %v2539_v53, 0.0  ;;  %v2731_v62 = vmax.f32 %v2603_v54, 0.0 }
 0x149   : > { %v2668_v0 = vmax.f32 %v2540_v59, 0.0  ;;  %v2732_v2 = vmax.f32 %v2604_v60, 0.0 }
 0x14a   : > { %v1531_v3 = vpop.f32.mrb[20].mxu0  ;;  %v1787_v4 = vpop.f32.mrb[20].mxu1 }
 0x14b   : > { %v4009_v5 = vpack.c.bf16 %v2668_v0, %v2667_v61  ;;  %v4169_v6 = vpack.c.bf16 %v2732_v2, %v2731_v62  ;;  %v2406_v7 = vmul.f32 %v5032_v63, %v1531_v3  ;;  %v2470_v8 = vmul.f32 %v5032_v63, %v1787_v4  ;;  %v1533_v9 = vpop.f32.mrb[21].mxu0  ;;  %v1789_v10 = vpop.f32.mrb[21].mxu1 }
 0x14c   : > { %v1534_v11 = vpop.f32.mrb[22].mxu0  ;;  %v1790_v12 = vpop.f32.mrb[22].mxu1 }
 0x14d   : > { %4309 = vst [vmem:[%s5060_s21 + $0x20] sm:$0xff] %v4009_v5   ;;  %4341 = vst [vmem:[%s5060_s21 + $0x120] sm:$0xff] %v4169_v6   ;;  %v2541_v13 = vadd.f32 %v5037_v1, %v2406_v7  ;;  %v2605_v14 = vadd.f32 %v5037_v1, %v2470_v8  ;;  %v2407_v15 = vmul.f32 %v5032_v63, %v1534_v11  ;;  %v1536_v17 = vpop.f32.mrb[23].mxu0  ;;  %v1792_v18 = vpop.f32.mrb[23].mxu1 }
 0x14e   : > { %v2471_v16 = vmul.f32 %v5032_v63, %v1790_v12 }
 0x14f   : > { %v2542_v19 = vadd.f32 %v5037_v1, %v2407_v15  ;;  %v2669_v21 = vmax.f32 %v2541_v13, 0.0  ;;  %v2733_v22 = vmax.f32 %v2605_v14, 0.0 }
 0x150   : > { %v2606_v20 = vadd.f32 %v5037_v1, %v2471_v16 }
 0x151   : > { %v2670_v23 = vmax.f32 %v2542_v19, 0.0 }
 0x152   : > { %v2734_v24 = vmax.f32 %v2606_v20, 0.0  ;;  %v1539_v25 = vpop.f32.mrb[24].mxu0  ;;  %v1795_v26 = vpop.f32.mrb[24].mxu1 }
 0x153   : > { %v4014_v27 = vpack.c.bf16 %v2670_v23, %v2669_v21  ;;  %v2408_v29 = vmul.f32 %v5032_v63, %v1539_v25  ;;  %v2472_v30 = vmul.f32 %v5032_v63, %v1795_v26  ;;  %v1541_v31 = vpop.f32.mrb[25].mxu0  ;;  %v1797_v32 = vpop.f32.mrb[25].mxu1 }
 0x154   : > { %v4174_v28 = vpack.c.bf16 %v2734_v24, %v2733_v22  ;;  %v1542_v33 = vpop.f32.mrb[26].mxu0  ;;  %v1798_v34 = vpop.f32.mrb[26].mxu1 }
 0x155   : > { %4310 = vst [vmem:[%s5060_s21 + $0x28] sm:$0xff] %v4014_v27   ;;  %v2543_v35 = vadd.f32 %v5037_v1, %v2408_v29  ;;  %v2607_v36 = vadd.f32 %v5037_v1, %v2472_v30  ;;  %v2409_v37 = vmul.f32 %v5032_v63, %v1542_v33  ;;  %v2473_v38 = vmul.f32 %v5032_v63, %v1798_v34  ;;  %v1544_v39 = vpop.f32.mrb[27].mxu0  ;;  %v1800_v40 = vpop.f32.mrb[27].mxu1 }
 0x156   : > { %4342 = vst [vmem:[%s5060_s21 + $0x128] sm:$0xff] %v4174_v28  }
 0x157   : > { %v2544_v41 = vadd.f32 %v5037_v1, %v2409_v37  ;;  %v2608_v42 = vadd.f32 %v5037_v1, %v2473_v38  ;;  %v2671_v43 = vmax.f32 %v2543_v35, 0.0  ;;  %v2735_v44 = vmax.f32 %v2607_v36, 0.0 }
 0x159   : > { %v2672_v45 = vmax.f32 %v2544_v41, 0.0  ;;  %v2736_v46 = vmax.f32 %v2608_v42, 0.0 }
 0x15a   : > { %v1547_v47 = vpop.f32.mrb[28].mxu0  ;;  %v1803_v48 = vpop.f32.mrb[28].mxu1 }
 0x15b   : > { %v4019_v49 = vpack.c.bf16 %v2672_v45, %v2671_v43  ;;  %v4179_v50 = vpack.c.bf16 %v2736_v46, %v2735_v44  ;;  %v2410_v51 = vmul.f32 %v5032_v63, %v1547_v47  ;;  %v2474_v52 = vmul.f32 %v5032_v63, %v1803_v48  ;;  %v1549_v53 = vpop.f32.mrb[29].mxu0  ;;  %v1805_v54 = vpop.f32.mrb[29].mxu1 }
 0x15c   : > { %v1550_v55 = vpop.f32.mrb[30].mxu0  ;;  %v1806_v56 = vpop.f32.mrb[30].mxu1 }
 0x15d   : > { %4311 = vst [vmem:[%s5060_s21 + $0x30] sm:$0xff] %v4019_v49   ;;  %4343 = vst [vmem:[%s5060_s21 + $0x130] sm:$0xff] %v4179_v50   ;;  %v2545_v57 = vadd.f32 %v5037_v1, %v2410_v51  ;;  %v2609_v58 = vadd.f32 %v5037_v1, %v2474_v52  ;;  %v2411_v59 = vmul.f32 %v5032_v63, %v1550_v55  ;;  %v1552_v61 = vpop.f32.mrb[31].mxu0  ;;  %v1808_v62 = vpop.f32.mrb[31].mxu1 }
 0x15e   : > { %v2475_v60 = vmul.f32 %v5032_v63, %v1806_v56 }
 0x15f   : > { %v2546_v0 = vadd.f32 %v5037_v1, %v2411_v59  ;;  %v2673_v3 = vmax.f32 %v2545_v57, 0.0  ;;  %v2737_v4 = vmax.f32 %v2609_v58, 0.0 }
 0x160   : > { %v2610_v2 = vadd.f32 %v5037_v1, %v2475_v60 }
 0x161   : > { %v2674_v5 = vmax.f32 %v2546_v0, 0.0 }
 0x162   : > { %v2738_v6 = vmax.f32 %v2610_v2, 0.0  ;;  %v1555_v7 = vpop.f32.mrb[32].mxu0  ;;  %v1811_v8 = vpop.f32.mrb[32].mxu1 }
 0x163   : > { %v4024_v9 = vpack.c.bf16 %v2674_v5, %v2673_v3  ;;  %v2412_v11 = vmul.f32 %v5032_v63, %v1555_v7  ;;  %v2476_v12 = vmul.f32 %v5032_v63, %v1811_v8  ;;  %v1557_v13 = vpop.f32.mrb[33].mxu0  ;;  %v1813_v14 = vpop.f32.mrb[33].mxu1 }
 0x164   : > { %v4184_v10 = vpack.c.bf16 %v2738_v6, %v2737_v4  ;;  %v1558_v15 = vpop.f32.mrb[34].mxu0  ;;  %v1814_v16 = vpop.f32.mrb[34].mxu1 }
 0x165   : > { %4312 = vst [vmem:[%s5060_s21 + $0x38] sm:$0xff] %v4024_v9   ;;  %v2547_v17 = vadd.f32 %v5037_v1, %v2412_v11  ;;  %v2611_v18 = vadd.f32 %v5037_v1, %v2476_v12  ;;  %v2413_v19 = vmul.f32 %v5032_v63, %v1558_v15  ;;  %v2477_v20 = vmul.f32 %v5032_v63, %v1814_v16  ;;  %v1560_v21 = vpop.f32.mrb[35].mxu0  ;;  %v1816_v22 = vpop.f32.mrb[35].mxu1 }
 0x166   : > { %4344 = vst [vmem:[%s5060_s21 + $0x138] sm:$0xff] %v4184_v10  }
 0x167   : > { %v2548_v23 = vadd.f32 %v5037_v1, %v2413_v19  ;;  %v2612_v24 = vadd.f32 %v5037_v1, %v2477_v20  ;;  %v2675_v25 = vmax.f32 %v2547_v17, 0.0  ;;  %v2739_v26 = vmax.f32 %v2611_v18, 0.0 }
 0x169   : > { %v2676_v27 = vmax.f32 %v2548_v23, 0.0  ;;  %v2740_v28 = vmax.f32 %v2612_v24, 0.0 }
 0x16a   : > { %v1563_v29 = vpop.f32.mrb[36].mxu0  ;;  %v1819_v30 = vpop.f32.mrb[36].mxu1 }
 0x16b   : > { %v4029_v31 = vpack.c.bf16 %v2676_v27, %v2675_v25  ;;  %v4189_v32 = vpack.c.bf16 %v2740_v28, %v2739_v26  ;;  %v2414_v33 = vmul.f32 %v5032_v63, %v1563_v29  ;;  %v2478_v34 = vmul.f32 %v5032_v63, %v1819_v30  ;;  %v1565_v35 = vpop.f32.mrb[37].mxu0  ;;  %v1821_v36 = vpop.f32.mrb[37].mxu1 }
 0x16c   : > { %v1566_v37 = vpop.f32.mrb[38].mxu0  ;;  %v1822_v38 = vpop.f32.mrb[38].mxu1 }
 0x16d   : > { %4313 = vst [vmem:[%s5060_s21 + $0x40] sm:$0xff] %v4029_v31   ;;  %4345 = vst [vmem:[%s5060_s21 + $0x140] sm:$0xff] %v4189_v32   ;;  %v2549_v39 = vadd.f32 %v5037_v1, %v2414_v33  ;;  %v2613_v40 = vadd.f32 %v5037_v1, %v2478_v34  ;;  %v2415_v41 = vmul.f32 %v5032_v63, %v1566_v37  ;;  %v1568_v43 = vpop.f32.mrb[39].mxu0  ;;  %v1824_v44 = vpop.f32.mrb[39].mxu1 }
 0x16e   : > { %v2479_v42 = vmul.f32 %v5032_v63, %v1822_v38 }
 0x16f   : > { %v2550_v45 = vadd.f32 %v5037_v1, %v2415_v41  ;;  %v2677_v47 = vmax.f32 %v2549_v39, 0.0  ;;  %v2741_v48 = vmax.f32 %v2613_v40, 0.0 }
 0x170   : > { %v2614_v46 = vadd.f32 %v5037_v1, %v2479_v42 }
 0x171   : > { %v2678_v49 = vmax.f32 %v2550_v45, 0.0 }
 0x172   : > { %v2742_v50 = vmax.f32 %v2614_v46, 0.0  ;;  %v1571_v51 = vpop.f32.mrb[40].mxu0  ;;  %v1827_v52 = vpop.f32.mrb[40].mxu1 }
 0x173   : > { %v4034_v53 = vpack.c.bf16 %v2678_v49, %v2677_v47  ;;  %v2416_v55 = vmul.f32 %v5032_v63, %v1571_v51  ;;  %v2480_v56 = vmul.f32 %v5032_v63, %v1827_v52  ;;  %v1573_v57 = vpop.f32.mrb[41].mxu0  ;;  %v1829_v58 = vpop.f32.mrb[41].mxu1 }
 0x174   : > { %v4194_v54 = vpack.c.bf16 %v2742_v50, %v2741_v48  ;;  %v1574_v59 = vpop.f32.mrb[42].mxu0  ;;  %v1830_v60 = vpop.f32.mrb[42].mxu1 }
 0x175   : > { %4314 = vst [vmem:[%s5060_s21 + $0x48] sm:$0xff] %v4034_v53   ;;  %v2551_v61 = vadd.f32 %v5037_v1, %v2416_v55  ;;  %v2615_v62 = vadd.f32 %v5037_v1, %v2480_v56  ;;  %v2417_v0 = vmul.f32 %v5032_v63, %v1574_v59  ;;  %v2481_v2 = vmul.f32 %v5032_v63, %v1830_v60  ;;  %v1576_v3 = vpop.f32.mrb[43].mxu0  ;;  %v1832_v4 = vpop.f32.mrb[43].mxu1 }
 0x176   : > { %4346 = vst [vmem:[%s5060_s21 + $0x148] sm:$0xff] %v4194_v54  }
 0x177   : > { %v2552_v5 = vadd.f32 %v5037_v1, %v2417_v0  ;;  %v2616_v6 = vadd.f32 %v5037_v1, %v2481_v2  ;;  %v2679_v7 = vmax.f32 %v2551_v61, 0.0  ;;  %v2743_v8 = vmax.f32 %v2615_v62, 0.0 }
 0x179   : > { %v2680_v9 = vmax.f32 %v2552_v5, 0.0  ;;  %v2744_v10 = vmax.f32 %v2616_v6, 0.0 }
 0x17a   : > { %v1579_v11 = vpop.f32.mrb[44].mxu0  ;;  %v1835_v12 = vpop.f32.mrb[44].mxu1 }
 0x17b   : > { %v4039_v13 = vpack.c.bf16 %v2680_v9, %v2679_v7  ;;  %v4199_v14 = vpack.c.bf16 %v2744_v10, %v2743_v8  ;;  %v2418_v15 = vmul.f32 %v5032_v63, %v1579_v11  ;;  %v2482_v16 = vmul.f32 %v5032_v63, %v1835_v12  ;;  %v1581_v17 = vpop.f32.mrb[45].mxu0  ;;  %v1837_v18 = vpop.f32.mrb[45].mxu1 }
 0x17c   : > { %v1582_v19 = vpop.f32.mrb[46].mxu0  ;;  %v1838_v20 = vpop.f32.mrb[46].mxu1 }
 0x17d   : > { %4315 = vst [vmem:[%s5060_s21 + $0x50] sm:$0xff] %v4039_v13   ;;  %4347 = vst [vmem:[%s5060_s21 + $0x150] sm:$0xff] %v4199_v14   ;;  %v2553_v21 = vadd.f32 %v5037_v1, %v2418_v15  ;;  %v2617_v22 = vadd.f32 %v5037_v1, %v2482_v16  ;;  %v2419_v23 = vmul.f32 %v5032_v63, %v1582_v19  ;;  %v1584_v25 = vpop.f32.mrb[47].mxu0  ;;  %v1840_v26 = vpop.f32.mrb[47].mxu1 }
 0x17e   : > { %v2483_v24 = vmul.f32 %v5032_v63, %v1838_v20 }
 0x17f   : > { %v2554_v27 = vadd.f32 %v5037_v1, %v2419_v23  ;;  %v2681_v29 = vmax.f32 %v2553_v21, 0.0  ;;  %v2745_v30 = vmax.f32 %v2617_v22, 0.0 }
 0x180   : > { %v2618_v28 = vadd.f32 %v5037_v1, %v2483_v24 }
 0x181   : > { %v2682_v31 = vmax.f32 %v2554_v27, 0.0 }
 0x182   : > { %v2746_v32 = vmax.f32 %v2618_v28, 0.0  ;;  %v1587_v33 = vpop.f32.mrb[48].mxu0  ;;  %v1843_v34 = vpop.f32.mrb[48].mxu1 }
 0x183   : > { %v4044_v35 = vpack.c.bf16 %v2682_v31, %v2681_v29  ;;  %v2420_v37 = vmul.f32 %v5032_v63, %v1587_v33  ;;  %v2484_v38 = vmul.f32 %v5032_v63, %v1843_v34  ;;  %v1589_v39 = vpop.f32.mrb[49].mxu0  ;;  %v1845_v40 = vpop.f32.mrb[49].mxu1 }
 0x184   : > { %v4204_v36 = vpack.c.bf16 %v2746_v32, %v2745_v30  ;;  %v1590_v41 = vpop.f32.mrb[50].mxu0  ;;  %v1846_v42 = vpop.f32.mrb[50].mxu1 }
 0x185   : > { %4316 = vst [vmem:[%s5060_s21 + $0x58] sm:$0xff] %v4044_v35   ;;  %v2555_v43 = vadd.f32 %v5037_v1, %v2420_v37  ;;  %v2619_v44 = vadd.f32 %v5037_v1, %v2484_v38  ;;  %v2421_v45 = vmul.f32 %v5032_v63, %v1590_v41  ;;  %v2485_v46 = vmul.f32 %v5032_v63, %v1846_v42  ;;  %v1592_v47 = vpop.f32.mrb[51].mxu0  ;;  %v1848_v48 = vpop.f32.mrb[51].mxu1 }
 0x186   : > { %4348 = vst [vmem:[%s5060_s21 + $0x158] sm:$0xff] %v4204_v36  }
 0x187   : > { %v2556_v49 = vadd.f32 %v5037_v1, %v2421_v45  ;;  %v2620_v50 = vadd.f32 %v5037_v1, %v2485_v46  ;;  %v2683_v51 = vmax.f32 %v2555_v43, 0.0  ;;  %v2747_v52 = vmax.f32 %v2619_v44, 0.0 }
 0x189   : > { %v2684_v53 = vmax.f32 %v2556_v49, 0.0  ;;  %v2748_v54 = vmax.f32 %v2620_v50, 0.0 }
 0x18a   : > { %v1595_v55 = vpop.f32.mrb[52].mxu0  ;;  %v1851_v56 = vpop.f32.mrb[52].mxu1 }
 0x18b   : > { %v4049_v57 = vpack.c.bf16 %v2684_v53, %v2683_v51  ;;  %v4209_v58 = vpack.c.bf16 %v2748_v54, %v2747_v52  ;;  %v2422_v59 = vmul.f32 %v5032_v63, %v1595_v55  ;;  %v2486_v60 = vmul.f32 %v5032_v63, %v1851_v56  ;;  %v1597_v61 = vpop.f32.mrb[53].mxu0  ;;  %v1853_v62 = vpop.f32.mrb[53].mxu1 }
 0x18c   : > { %v1598_v0 = vpop.f32.mrb[54].mxu0  ;;  %v1854_v2 = vpop.f32.mrb[54].mxu1 }
 0x18d   : > { %4317 = vst [vmem:[%s5060_s21 + $0x60] sm:$0xff] %v4049_v57   ;;  %4349 = vst [vmem:[%s5060_s21 + $0x160] sm:$0xff] %v4209_v58   ;;  %v2557_v3 = vadd.f32 %v5037_v1, %v2422_v59  ;;  %v2621_v4 = vadd.f32 %v5037_v1, %v2486_v60  ;;  %v2423_v5 = vmul.f32 %v5032_v63, %v1598_v0  ;;  %v1600_v7 = vpop.f32.mrb[55].mxu0  ;;  %v1856_v8 = vpop.f32.mrb[55].mxu1 }
 0x18e   : > { %v2487_v6 = vmul.f32 %v5032_v63, %v1854_v2 }
 0x18f   : > { %v2558_v9 = vadd.f32 %v5037_v1, %v2423_v5  ;;  %v2685_v11 = vmax.f32 %v2557_v3, 0.0  ;;  %v2749_v12 = vmax.f32 %v2621_v4, 0.0 }
 0x190   : > { %v2622_v10 = vadd.f32 %v5037_v1, %v2487_v6 }
 0x191   : > { %v2686_v13 = vmax.f32 %v2558_v9, 0.0 }
 0x192   : > { %v2750_v14 = vmax.f32 %v2622_v10, 0.0  ;;  %v1603_v15 = vpop.f32.mrb[56].mxu0  ;;  %v1859_v16 = vpop.f32.mrb[56].mxu1 }
 0x193   : > { %v4054_v17 = vpack.c.bf16 %v2686_v13, %v2685_v11  ;;  %v2424_v19 = vmul.f32 %v5032_v63, %v1603_v15  ;;  %v2488_v20 = vmul.f32 %v5032_v63, %v1859_v16  ;;  %v1605_v21 = vpop.f32.mrb[57].mxu0  ;;  %v1861_v22 = vpop.f32.mrb[57].mxu1 }
 0x194   : > { %v4214_v18 = vpack.c.bf16 %v2750_v14, %v2749_v12  ;;  %v1606_v23 = vpop.f32.mrb[58].mxu0  ;;  %v1862_v24 = vpop.f32.mrb[58].mxu1 }
 0x195   : > { %4318 = vst [vmem:[%s5060_s21 + $0x68] sm:$0xff] %v4054_v17   ;;  %v2559_v25 = vadd.f32 %v5037_v1, %v2424_v19  ;;  %v2623_v26 = vadd.f32 %v5037_v1, %v2488_v20  ;;  %v2425_v27 = vmul.f32 %v5032_v63, %v1606_v23  ;;  %v2489_v28 = vmul.f32 %v5032_v63, %v1862_v24  ;;  %v1608_v29 = vpop.f32.mrb[59].mxu0  ;;  %v1864_v30 = vpop.f32.mrb[59].mxu1 }
 0x196   : > { %4350 = vst [vmem:[%s5060_s21 + $0x168] sm:$0xff] %v4214_v18  }
 0x197   : > { %v2560_v31 = vadd.f32 %v5037_v1, %v2425_v27  ;;  %v2624_v32 = vadd.f32 %v5037_v1, %v2489_v28  ;;  %v2687_v33 = vmax.f32 %v2559_v25, 0.0  ;;  %v2751_v34 = vmax.f32 %v2623_v26, 0.0 }
 0x199   : > { %v2688_v35 = vmax.f32 %v2560_v31, 0.0  ;;  %v2752_v36 = vmax.f32 %v2624_v32, 0.0 }
 0x19a   : > { %v1611_v37 = vpop.f32.mrb[60].mxu0  ;;  %v1867_v38 = vpop.f32.mrb[60].mxu1 }
 0x19b   : > { %v4059_v39 = vpack.c.bf16 %v2688_v35, %v2687_v33  ;;  %v4219_v40 = vpack.c.bf16 %v2752_v36, %v2751_v34  ;;  %v2426_v41 = vmul.f32 %v5032_v63, %v1611_v37  ;;  %v2490_v42 = vmul.f32 %v5032_v63, %v1867_v38  ;;  %v1613_v43 = vpop.f32.mrb[61].mxu0  ;;  %v1869_v44 = vpop.f32.mrb[61].mxu1 }
 0x19c   : > { %v1614_v45 = vpop.f32.mrb[62].mxu0  ;;  %v1870_v46 = vpop.f32.mrb[62].mxu1 }
 0x19d   : > { %4319 = vst [vmem:[%s5060_s21 + $0x70] sm:$0xff] %v4059_v39   ;;  %4351 = vst [vmem:[%s5060_s21 + $0x170] sm:$0xff] %v4219_v40   ;;  %v2561_v47 = vadd.f32 %v5037_v1, %v2426_v41  ;;  %v2625_v48 = vadd.f32 %v5037_v1, %v2490_v42  ;;  %v2427_v49 = vmul.f32 %v5032_v63, %v1614_v45  ;;  %v1616_v51 = vpop.f32.mrb[63].mxu0  ;;  %v1872_v52 = vpop.f32.mrb[63].mxu1 }
 0x19e   : > { %v2491_v50 = vmul.f32 %v5032_v63, %v1870_v46 }
 0x19f   : > { %v2562_v53 = vadd.f32 %v5037_v1, %v2427_v49  ;;  %v2689_v55 = vmax.f32 %v2561_v47, 0.0  ;;  %v2753_v56 = vmax.f32 %v2625_v48, 0.0 }
 0x1a0   : > { %v2626_v54 = vadd.f32 %v5037_v1, %v2491_v50 }
 0x1a1   : > { %v2690_v57 = vmax.f32 %v2562_v53, 0.0 }
 0x1a2   : > { %v2754_v58 = vmax.f32 %v2626_v54, 0.0  ;;  %v1619_v59 = vpop.f32.mrb[64].mxu0  ;;  %v1875_v60 = vpop.f32.mrb[64].mxu1 }
 0x1a3   : > { %v4064_v61 = vpack.c.bf16 %v2690_v57, %v2689_v55  ;;  %v2428_v0 = vmul.f32 %v5032_v63, %v1619_v59  ;;  %v2492_v2 = vmul.f32 %v5032_v63, %v1875_v60  ;;  %v1621_v3 = vpop.f32.mrb[65].mxu0  ;;  %v1877_v4 = vpop.f32.mrb[65].mxu1 }
 0x1a4   : > { %v4224_v62 = vpack.c.bf16 %v2754_v58, %v2753_v56  ;;  %v1622_v5 = vpop.f32.mrb[66].mxu0  ;;  %v1878_v6 = vpop.f32.mrb[66].mxu1 }
 0x1a5   : > { %4320 = vst [vmem:[%s5060_s21 + $0x78] sm:$0xff] %v4064_v61   ;;  %v2563_v7 = vadd.f32 %v5037_v1, %v2428_v0  ;;  %v2627_v8 = vadd.f32 %v5037_v1, %v2492_v2  ;;  %v2429_v9 = vmul.f32 %v5032_v63, %v1622_v5  ;;  %v2493_v10 = vmul.f32 %v5032_v63, %v1878_v6  ;;  %v1624_v11 = vpop.f32.mrb[67].mxu0  ;;  %v1880_v12 = vpop.f32.mrb[67].mxu1 }
 0x1a6   : > { %4352 = vst [vmem:[%s5060_s21 + $0x178] sm:$0xff] %v4224_v62  }
 0x1a7   : > { %v2564_v13 = vadd.f32 %v5037_v1, %v2429_v9  ;;  %v2628_v14 = vadd.f32 %v5037_v1, %v2493_v10  ;;  %v2691_v15 = vmax.f32 %v2563_v7, 0.0  ;;  %v2755_v16 = vmax.f32 %v2627_v8, 0.0 }
 0x1a9   : > { %v2692_v17 = vmax.f32 %v2564_v13, 0.0  ;;  %v2756_v18 = vmax.f32 %v2628_v14, 0.0 }
 0x1aa   : > { %v1627_v19 = vpop.f32.mrb[68].mxu0  ;;  %v1883_v20 = vpop.f32.mrb[68].mxu1 }
 0x1ab   : > { %v4069_v21 = vpack.c.bf16 %v2692_v17, %v2691_v15  ;;  %v4229_v22 = vpack.c.bf16 %v2756_v18, %v2755_v16  ;;  %v2430_v23 = vmul.f32 %v5032_v63, %v1627_v19  ;;  %v2494_v24 = vmul.f32 %v5032_v63, %v1883_v20  ;;  %v1629_v25 = vpop.f32.mrb[69].mxu0  ;;  %v1885_v26 = vpop.f32.mrb[69].mxu1 }
 0x1ac   : > { %v1630_v27 = vpop.f32.mrb[70].mxu0  ;;  %v1886_v28 = vpop.f32.mrb[70].mxu1 }
 0x1ad   : > { %4321 = vst [vmem:[%s5060_s21 + $0x80] sm:$0xff] %v4069_v21   ;;  %4353 = vst [vmem:[%s5060_s21 + $0x180] sm:$0xff] %v4229_v22   ;;  %v2565_v29 = vadd.f32 %v5037_v1, %v2430_v23  ;;  %v2629_v30 = vadd.f32 %v5037_v1, %v2494_v24  ;;  %v2431_v31 = vmul.f32 %v5032_v63, %v1630_v27  ;;  %v1632_v33 = vpop.f32.mrb[71].mxu0  ;;  %v1888_v34 = vpop.f32.mrb[71].mxu1 }
 0x1ae   : > { %v2495_v32 = vmul.f32 %v5032_v63, %v1886_v28 }
 0x1af   : > { %v2566_v35 = vadd.f32 %v5037_v1, %v2431_v31  ;;  %v2693_v37 = vmax.f32 %v2565_v29, 0.0  ;;  %v2757_v38 = vmax.f32 %v2629_v30, 0.0 }
 0x1b0   : > { %v2630_v36 = vadd.f32 %v5037_v1, %v2495_v32  ;;  %v5272_v32 = vld [vmem:[%s5452_s3] ss:$0 sm:$0xff] }
 0x1b1   : > { %v2694_v39 = vmax.f32 %v2566_v35, 0.0 }
 0x1b2   : > { %v2758_v40 = vmax.f32 %v2630_v36, 0.0  ;;  %v1635_v41 = vpop.f32.mrb[72].mxu0  ;;  %v1891_v42 = vpop.f32.mrb[72].mxu1 }
 0x1b3   : > { %v4074_v43 = vpack.c.bf16 %v2694_v39, %v2693_v37  ;;  %v2432_v45 = vmul.f32 %v5032_v63, %v1635_v41  ;;  %v2496_v46 = vmul.f32 %v5032_v63, %v1891_v42  ;;  %v1637_v47 = vpop.f32.mrb[73].mxu0  ;;  %v1893_v48 = vpop.f32.mrb[73].mxu1 }
 0x1b4   : > { %v4234_v44 = vpack.c.bf16 %v2758_v40, %v2757_v38  ;;  %v1638_v49 = vpop.f32.mrb[74].mxu0  ;;  %v1894_v50 = vpop.f32.mrb[74].mxu1 }
 0x1b5   : > { %4322 = vst [vmem:[%s5060_s21 + $0x88] sm:$0xff] %v4074_v43   ;;  %v2567_v51 = vadd.f32 %v5037_v1, %v2432_v45  ;;  %v2631_v52 = vadd.f32 %v5037_v1, %v2496_v46  ;;  %v2433_v53 = vmul.f32 %v5032_v63, %v1638_v49  ;;  %v2497_v54 = vmul.f32 %v5032_v63, %v1894_v50  ;;  %v1640_v55 = vpop.f32.mrb[75].mxu0  ;;  %v1896_v56 = vpop.f32.mrb[75].mxu1 }
 0x1b6   : > { %4354 = vst [vmem:[%s5060_s21 + $0x188] sm:$0xff] %v4234_v44  }
 0x1b7   : > { %v2568_v57 = vadd.f32 %v5037_v1, %v2433_v53  ;;  %v2632_v58 = vadd.f32 %v5037_v1, %v2497_v54  ;;  %v2695_v59 = vmax.f32 %v2567_v51, 0.0  ;;  %v2759_v60 = vmax.f32 %v2631_v52, 0.0 }
 0x1b9   : > { %v2696_v61 = vmax.f32 %v2568_v57, 0.0  ;;  %v2760_v62 = vmax.f32 %v2632_v58, 0.0 }
 0x1ba   : > { %v1643_v0 = vpop.f32.mrb[76].mxu0  ;;  %v1899_v2 = vpop.f32.mrb[76].mxu1 }
 0x1bb   : > { %v4079_v3 = vpack.c.bf16 %v2696_v61, %v2695_v59  ;;  %v4239_v4 = vpack.c.bf16 %v2760_v62, %v2759_v60  ;;  %v2434_v5 = vmul.f32 %v5032_v63, %v1643_v0  ;;  %v2498_v6 = vmul.f32 %v5032_v63, %v1899_v2  ;;  %v1645_v7 = vpop.f32.mrb[77].mxu0  ;;  %v1901_v8 = vpop.f32.mrb[77].mxu1 }
 0x1bc   : > { %v1646_v9 = vpop.f32.mrb[78].mxu0  ;;  %v1902_v10 = vpop.f32.mrb[78].mxu1 }
 0x1bd   : > { %4323 = vst [vmem:[%s5060_s21 + $0x90] sm:$0xff] %v4079_v3   ;;  %4355 = vst [vmem:[%s5060_s21 + $0x190] sm:$0xff] %v4239_v4   ;;  %v2569_v11 = vadd.f32 %v5037_v1, %v2434_v5  ;;  %v2633_v12 = vadd.f32 %v5037_v1, %v2498_v6  ;;  %v2435_v13 = vmul.f32 %v5032_v63, %v1646_v9  ;;  %v1648_v15 = vpop.f32.mrb[79].mxu0  ;;  %v1904_v16 = vpop.f32.mrb[79].mxu1 }
 0x1be   : > { %v2499_v14 = vmul.f32 %v5032_v63, %v1902_v10  ;;  %v5263_v63 = vld [vmem:[%s5451_s2] ss:$0 sm:$0xff] }
 0x1bf   : > { %v2570_v17 = vadd.f32 %v5037_v1, %v2435_v13  ;;  %v2697_v19 = vmax.f32 %v2569_v11, 0.0  ;;  %v2761_v20 = vmax.f32 %v2633_v12, 0.0 }
 0x1c0   : > { %v2634_v18 = vadd.f32 %v5037_v1, %v2499_v14 }
 0x1c1   : > { %v2698_v21 = vmax.f32 %v2570_v17, 0.0 }
 0x1c2   : > { %v2762_v22 = vmax.f32 %v2634_v18, 0.0  ;;  %v1651_v23 = vpop.f32.mrb[80].mxu0  ;;  %v1907_v24 = vpop.f32.mrb[80].mxu1 }
 0x1c3   : > { %v4084_v25 = vpack.c.bf16 %v2698_v21, %v2697_v19  ;;  %v2436_v27 = vmul.f32 %v5263_v63, %v1651_v23  ;;  %v2500_v28 = vmul.f32 %v5263_v63, %v1907_v24  ;;  %v1653_v1 = vpop.f32.mrb[81].mxu0  ;;  %v1909_v29 = vpop.f32.mrb[81].mxu1 }
 0x1c4   : > { %v4244_v26 = vpack.c.bf16 %v2762_v22, %v2761_v20  ;;  %v1654_v30 = vpop.f32.mrb[82].mxu0  ;;  %v1910_v31 = vpop.f32.mrb[82].mxu1 }
 0x1c5   : > { %4324 = vst [vmem:[%s5060_s21 + $0x98] sm:$0xff] %v4084_v25   ;;  %v2571_v33 = vadd.f32 %v5272_v32, %v2436_v27  ;;  %v2635_v34 = vadd.f32 %v5272_v32, %v2500_v28  ;;  %v2437_v35 = vmul.f32 %v5263_v63, %v1654_v30  ;;  %v2501_v36 = vmul.f32 %v5263_v63, %v1910_v31  ;;  %v1656_v37 = vpop.f32.mrb[83].mxu0  ;;  %v1912_v38 = vpop.f32.mrb[83].mxu1 }
 0x1c6   : > { %4356 = vst [vmem:[%s5060_s21 + $0x198] sm:$0xff] %v4244_v26  }
 0x1c7   : > { %v2572_v39 = vadd.f32 %v5272_v32, %v2437_v35  ;;  %v2636_v40 = vadd.f32 %v5272_v32, %v2501_v36  ;;  %v2699_v41 = vmax.f32 %v2571_v33, 0.0  ;;  %v2763_v42 = vmax.f32 %v2635_v34, 0.0 }
 0x1c9   : > { %v2700_v43 = vmax.f32 %v2572_v39, 0.0  ;;  %v2764_v44 = vmax.f32 %v2636_v40, 0.0 }
 0x1ca   : > { %v1659_v45 = vpop.f32.mrb[84].mxu0  ;;  %v1915_v46 = vpop.f32.mrb[84].mxu1 }
 0x1cb   : > { %v4089_v47 = vpack.c.bf16 %v2700_v43, %v2699_v41  ;;  %v4249_v48 = vpack.c.bf16 %v2764_v44, %v2763_v42  ;;  %v2438_v49 = vmul.f32 %v5263_v63, %v1659_v45  ;;  %v2502_v50 = vmul.f32 %v5263_v63, %v1915_v46  ;;  %v1661_v51 = vpop.f32.mrb[85].mxu0  ;;  %v1917_v52 = vpop.f32.mrb[85].mxu1 }
 0x1cc   : > { %v1662_v53 = vpop.f32.mrb[86].mxu0  ;;  %v1918_v54 = vpop.f32.mrb[86].mxu1 }
 0x1cd   : > { %4325 = vst [vmem:[%s5060_s21 + $0xa0] sm:$0xff] %v4089_v47   ;;  %4357 = vst [vmem:[%s5060_s21 + $0x1a0] sm:$0xff] %v4249_v48   ;;  %v2573_v55 = vadd.f32 %v5272_v32, %v2438_v49  ;;  %v2637_v56 = vadd.f32 %v5272_v32, %v2502_v50  ;;  %v2439_v57 = vmul.f32 %v5263_v63, %v1662_v53  ;;  %v1664_v59 = vpop.f32.mrb[87].mxu0  ;;  %v1920_v60 = vpop.f32.mrb[87].mxu1 }
 0x1ce   : > { %v2503_v58 = vmul.f32 %v5263_v63, %v1918_v54 }
 0x1cf   : > { %v2574_v61 = vadd.f32 %v5272_v32, %v2439_v57  ;;  %v2701_v0 = vmax.f32 %v2573_v55, 0.0  ;;  %v2765_v2 = vmax.f32 %v2637_v56, 0.0 }
 0x1d0   : > { %v2638_v62 = vadd.f32 %v5272_v32, %v2503_v58 }
 0x1d1   : > { %v2702_v3 = vmax.f32 %v2574_v61, 0.0 }
 0x1d2   : > { %v2766_v4 = vmax.f32 %v2638_v62, 0.0  ;;  %v1667_v5 = vpop.f32.mrb[88].mxu0  ;;  %v1923_v6 = vpop.f32.mrb[88].mxu1 }
 0x1d3   : > { %v4094_v7 = vpack.c.bf16 %v2702_v3, %v2701_v0  ;;  %v2440_v9 = vmul.f32 %v5263_v63, %v1667_v5  ;;  %v2504_v10 = vmul.f32 %v5263_v63, %v1923_v6  ;;  %v1669_v11 = vpop.f32.mrb[89].mxu0  ;;  %v1925_v12 = vpop.f32.mrb[89].mxu1 }
 0x1d4   : > { %v4254_v8 = vpack.c.bf16 %v2766_v4, %v2765_v2  ;;  %v1670_v13 = vpop.f32.mrb[90].mxu0  ;;  %v1926_v14 = vpop.f32.mrb[90].mxu1 }
 0x1d5   : > { %4326 = vst [vmem:[%s5060_s21 + $0xa8] sm:$0xff] %v4094_v7   ;;  %v2575_v15 = vadd.f32 %v5272_v32, %v2440_v9  ;;  %v2639_v16 = vadd.f32 %v5272_v32, %v2504_v10  ;;  %v2441_v17 = vmul.f32 %v5263_v63, %v1670_v13  ;;  %v2505_v18 = vmul.f32 %v5263_v63, %v1926_v14  ;;  %v1672_v19 = vpop.f32.mrb[91].mxu0  ;;  %v1928_v20 = vpop.f32.mrb[91].mxu1 }
 0x1d6   : > { %4358 = vst [vmem:[%s5060_s21 + $0x1a8] sm:$0xff] %v4254_v8  }
 0x1d7   : > { %v2576_v21 = vadd.f32 %v5272_v32, %v2441_v17  ;;  %v2640_v22 = vadd.f32 %v5272_v32, %v2505_v18  ;;  %v2703_v23 = vmax.f32 %v2575_v15, 0.0  ;;  %v2767_v24 = vmax.f32 %v2639_v16, 0.0 }
 0x1d9   : > { %v2704_v25 = vmax.f32 %v2576_v21, 0.0  ;;  %v2768_v26 = vmax.f32 %v2640_v22, 0.0 }
 0x1da   : > { %v1675_v27 = vpop.f32.mrb[92].mxu0  ;;  %v1931_v28 = vpop.f32.mrb[92].mxu1 }
 0x1db   : > { %v4099_v1 = vpack.c.bf16 %v2704_v25, %v2703_v23  ;;  %v4259_v29 = vpack.c.bf16 %v2768_v26, %v2767_v24  ;;  %v2442_v30 = vmul.f32 %v5263_v63, %v1675_v27  ;;  %v2506_v31 = vmul.f32 %v5263_v63, %v1931_v28  ;;  %v1677_v33 = vpop.f32.mrb[93].mxu0  ;;  %v1933_v34 = vpop.f32.mrb[93].mxu1 }
 0x1dc   : > { %v1678_v35 = vpop.f32.mrb[94].mxu0  ;;  %v1934_v36 = vpop.f32.mrb[94].mxu1 }
 0x1dd   : > { %4327 = vst [vmem:[%s5060_s21 + $0xb0] sm:$0xff] %v4099_v1   ;;  %4359 = vst [vmem:[%s5060_s21 + $0x1b0] sm:$0xff] %v4259_v29   ;;  %v2577_v37 = vadd.f32 %v5272_v32, %v2442_v30  ;;  %v2641_v38 = vadd.f32 %v5272_v32, %v2506_v31  ;;  %v2443_v39 = vmul.f32 %v5263_v63, %v1678_v35  ;;  %v1680_v41 = vpop.f32.mrb[95].mxu0  ;;  %v1936_v42 = vpop.f32.mrb[95].mxu1 }
 0x1de   : > { %v2507_v40 = vmul.f32 %v5263_v63, %v1934_v36 }
 0x1df   : > { %v2578_v43 = vadd.f32 %v5272_v32, %v2443_v39  ;;  %v2705_v45 = vmax.f32 %v2577_v37, 0.0  ;;  %v2769_v46 = vmax.f32 %v2641_v38, 0.0 }
 0x1e0   : > { %v2642_v44 = vadd.f32 %v5272_v32, %v2507_v40 }
 0x1e1   : > { %v2706_v47 = vmax.f32 %v2578_v43, 0.0 }
 0x1e2   : > { %v2770_v48 = vmax.f32 %v2642_v44, 0.0  ;;  %v1683_v49 = vpop.f32.mrb[96].mxu0  ;;  %v1939_v50 = vpop.f32.mrb[96].mxu1 }
 0x1e3   : > { %v4104_v51 = vpack.c.bf16 %v2706_v47, %v2705_v45  ;;  %v2444_v53 = vmul.f32 %v5263_v63, %v1683_v49  ;;  %v2508_v54 = vmul.f32 %v5263_v63, %v1939_v50  ;;  %v1685_v55 = vpop.f32.mrb[97].mxu0  ;;  %v1941_v56 = vpop.f32.mrb[97].mxu1 }
 0x1e4   : > { %v4264_v52 = vpack.c.bf16 %v2770_v48, %v2769_v46  ;;  %v1686_v57 = vpop.f32.mrb[98].mxu0  ;;  %v1942_v58 = vpop.f32.mrb[98].mxu1 }
 0x1e5   : > { %4328 = vst [vmem:[%s5060_s21 + $0xb8] sm:$0xff] %v4104_v51   ;;  %v2579_v59 = vadd.f32 %v5272_v32, %v2444_v53  ;;  %v2643_v60 = vadd.f32 %v5272_v32, %v2508_v54  ;;  %v2445_v61 = vmul.f32 %v5263_v63, %v1686_v57  ;;  %v2509_v62 = vmul.f32 %v5263_v63, %v1942_v58  ;;  %v1688_v0 = vpop.f32.mrb[99].mxu0  ;;  %v1944_v2 = vpop.f32.mrb[99].mxu1 }
 0x1e6   : > { %4360 = vst [vmem:[%s5060_s21 + $0x1b8] sm:$0xff] %v4264_v52  }
 0x1e7   : > { %v2580_v3 = vadd.f32 %v5272_v32, %v2445_v61  ;;  %v2644_v4 = vadd.f32 %v5272_v32, %v2509_v62  ;;  %v2707_v5 = vmax.f32 %v2579_v59, 0.0  ;;  %v2771_v6 = vmax.f32 %v2643_v60, 0.0 }
 0x1e9   : > { %v2708_v7 = vmax.f32 %v2580_v3, 0.0  ;;  %v2772_v8 = vmax.f32 %v2644_v4, 0.0 }
 0x1ea   : > { %v1691_v9 = vpop.f32.mrb[100].mxu0  ;;  %v1947_v10 = vpop.f32.mrb[100].mxu1 }
 0x1eb   : > { %v4109_v11 = vpack.c.bf16 %v2708_v7, %v2707_v5  ;;  %v4269_v12 = vpack.c.bf16 %v2772_v8, %v2771_v6  ;;  %v2446_v13 = vmul.f32 %v5263_v63, %v1691_v9  ;;  %v2510_v14 = vmul.f32 %v5263_v63, %v1947_v10  ;;  %v1693_v15 = vpop.f32.mrb[101].mxu0  ;;  %v1949_v16 = vpop.f32.mrb[101].mxu1 }
 0x1ec   : > { %v1694_v17 = vpop.f32.mrb[102].mxu0  ;;  %v1950_v18 = vpop.f32.mrb[102].mxu1 }
 0x1ed   : > { %4329 = vst [vmem:[%s5060_s21 + $0xc0] sm:$0xff] %v4109_v11   ;;  %4361 = vst [vmem:[%s5060_s21 + $0x1c0] sm:$0xff] %v4269_v12   ;;  %v2581_v19 = vadd.f32 %v5272_v32, %v2446_v13  ;;  %v2645_v20 = vadd.f32 %v5272_v32, %v2510_v14  ;;  %v2447_v21 = vmul.f32 %v5263_v63, %v1694_v17  ;;  %v1696_v23 = vpop.f32.mrb[103].mxu0  ;;  %v1952_v24 = vpop.f32.mrb[103].mxu1 }
 0x1ee   : > { %v2511_v22 = vmul.f32 %v5263_v63, %v1950_v18 }
 0x1ef   : > { %v2582_v25 = vadd.f32 %v5272_v32, %v2447_v21  ;;  %v2709_v27 = vmax.f32 %v2581_v19, 0.0  ;;  %v2773_v28 = vmax.f32 %v2645_v20, 0.0 }
 0x1f0   : > { %v2646_v26 = vadd.f32 %v5272_v32, %v2511_v22 }
 0x1f1   : > { %v2710_v1 = vmax.f32 %v2582_v25, 0.0 }
 0x1f2   : > { %v2774_v29 = vmax.f32 %v2646_v26, 0.0  ;;  %v1699_v30 = vpop.f32.mrb[104].mxu0  ;;  %v1955_v31 = vpop.f32.mrb[104].mxu1 }
 0x1f3   : > { %v4114_v33 = vpack.c.bf16 %v2710_v1, %v2709_v27  ;;  %v2448_v35 = vmul.f32 %v5263_v63, %v1699_v30  ;;  %v2512_v36 = vmul.f32 %v5263_v63, %v1955_v31  ;;  %v1701_v37 = vpop.f32.mrb[105].mxu0  ;;  %v1957_v38 = vpop.f32.mrb[105].mxu1 }
 0x1f4   : > { %v4274_v34 = vpack.c.bf16 %v2774_v29, %v2773_v28  ;;  %v1702_v39 = vpop.f32.mrb[106].mxu0  ;;  %v1958_v40 = vpop.f32.mrb[106].mxu1 }
 0x1f5   : > { %4330 = vst [vmem:[%s5060_s21 + $0xc8] sm:$0xff] %v4114_v33   ;;  %v2583_v41 = vadd.f32 %v5272_v32, %v2448_v35  ;;  %v2647_v42 = vadd.f32 %v5272_v32, %v2512_v36  ;;  %v2449_v43 = vmul.f32 %v5263_v63, %v1702_v39  ;;  %v2513_v44 = vmul.f32 %v5263_v63, %v1958_v40  ;;  %v1704_v45 = vpop.f32.mrb[107].mxu0  ;;  %v1960_v46 = vpop.f32.mrb[107].mxu1 }
 0x1f6   : > { %4362 = vst [vmem:[%s5060_s21 + $0x1c8] sm:$0xff] %v4274_v34  }
 0x1f7   : > { %v2584_v47 = vadd.f32 %v5272_v32, %v2449_v43  ;;  %v2648_v48 = vadd.f32 %v5272_v32, %v2513_v44  ;;  %v2711_v49 = vmax.f32 %v2583_v41, 0.0  ;;  %v2775_v50 = vmax.f32 %v2647_v42, 0.0 }
 0x1f9   : > { %v2712_v51 = vmax.f32 %v2584_v47, 0.0  ;;  %v2776_v52 = vmax.f32 %v2648_v48, 0.0 }
 0x1fa   : > { %v1707_v53 = vpop.f32.mrb[108].mxu0  ;;  %v1963_v54 = vpop.f32.mrb[108].mxu1 }
 0x1fb   : > { %v4119_v55 = vpack.c.bf16 %v2712_v51, %v2711_v49  ;;  %v4279_v56 = vpack.c.bf16 %v2776_v52, %v2775_v50  ;;  %v2450_v57 = vmul.f32 %v5263_v63, %v1707_v53  ;;  %v2514_v58 = vmul.f32 %v5263_v63, %v1963_v54  ;;  %v1709_v59 = vpop.f32.mrb[109].mxu0  ;;  %v1965_v60 = vpop.f32.mrb[109].mxu1 }
 0x1fc   : > { %v1710_v61 = vpop.f32.mrb[110].mxu0  ;;  %v1966_v62 = vpop.f32.mrb[110].mxu1 }
 0x1fd   : > { %4331 = vst [vmem:[%s5060_s21 + $0xd0] sm:$0xff] %v4119_v55   ;;  %4363 = vst [vmem:[%s5060_s21 + $0x1d0] sm:$0xff] %v4279_v56   ;;  %v2585_v0 = vadd.f32 %v5272_v32, %v2450_v57  ;;  %v2649_v2 = vadd.f32 %v5272_v32, %v2514_v58  ;;  %v2451_v3 = vmul.f32 %v5263_v63, %v1710_v61  ;;  %v1712_v5 = vpop.f32.mrb[111].mxu0  ;;  %v1968_v6 = vpop.f32.mrb[111].mxu1 }
 0x1fe   : > { %v2515_v4 = vmul.f32 %v5263_v63, %v1966_v62 }
 0x1ff   : > { %v2586_v7 = vadd.f32 %v5272_v32, %v2451_v3  ;;  %v2713_v9 = vmax.f32 %v2585_v0, 0.0  ;;  %v2777_v10 = vmax.f32 %v2649_v2, 0.0 }
 0x200   : > { %v2650_v8 = vadd.f32 %v5272_v32, %v2515_v4 }
 0x201   : > { %v2714_v11 = vmax.f32 %v2586_v7, 0.0 }
 0x202   : > { %v2778_v12 = vmax.f32 %v2650_v8, 0.0  ;;  %v1715_v13 = vpop.f32.mrb[112].mxu0  ;;  %v1971_v14 = vpop.f32.mrb[112].mxu1 }
 0x203   : > { %v4124_v15 = vpack.c.bf16 %v2714_v11, %v2713_v9  ;;  %v2452_v17 = vmul.f32 %v5263_v63, %v1715_v13  ;;  %v2516_v18 = vmul.f32 %v5263_v63, %v1971_v14  ;;  %v1717_v19 = vpop.f32.mrb[113].mxu0  ;;  %v1973_v20 = vpop.f32.mrb[113].mxu1 }
 0x204   : > { %v4284_v16 = vpack.c.bf16 %v2778_v12, %v2777_v10  ;;  %v1718_v21 = vpop.f32.mrb[114].mxu0  ;;  %v1974_v22 = vpop.f32.mrb[114].mxu1 }
 0x205   : > { %4332 = vst [vmem:[%s5060_s21 + $0xd8] sm:$0xff] %v4124_v15   ;;  %v2587_v23 = vadd.f32 %v5272_v32, %v2452_v17  ;;  %v2651_v24 = vadd.f32 %v5272_v32, %v2516_v18  ;;  %v2453_v25 = vmul.f32 %v5263_v63, %v1718_v21  ;;  %v2517_v26 = vmul.f32 %v5263_v63, %v1974_v22  ;;  %v1720_v27 = vpop.f32.mrb[115].mxu0  ;;  %v1976_v28 = vpop.f32.mrb[115].mxu1 }
 0x206   : > { %4364 = vst [vmem:[%s5060_s21 + $0x1d8] sm:$0xff] %v4284_v16  }
 0x207   : > { %v2588_v1 = vadd.f32 %v5272_v32, %v2453_v25  ;;  %v2652_v29 = vadd.f32 %v5272_v32, %v2517_v26  ;;  %v2715_v30 = vmax.f32 %v2587_v23, 0.0  ;;  %v2779_v31 = vmax.f32 %v2651_v24, 0.0 }
 0x209   : > { %v2716_v33 = vmax.f32 %v2588_v1, 0.0  ;;  %v2780_v34 = vmax.f32 %v2652_v29, 0.0 }
 0x20a   : > { %v1723_v35 = vpop.f32.mrb[116].mxu0  ;;  %v1979_v36 = vpop.f32.mrb[116].mxu1 }
 0x20b   : > { %v4129_v37 = vpack.c.bf16 %v2716_v33, %v2715_v30  ;;  %v4289_v38 = vpack.c.bf16 %v2780_v34, %v2779_v31  ;;  %v2454_v39 = vmul.f32 %v5263_v63, %v1723_v35  ;;  %v2518_v40 = vmul.f32 %v5263_v63, %v1979_v36  ;;  %v1725_v41 = vpop.f32.mrb[117].mxu0  ;;  %v1981_v42 = vpop.f32.mrb[117].mxu1 }
 0x20c   : > { %v1726_v43 = vpop.f32.mrb[118].mxu0  ;;  %v1982_v44 = vpop.f32.mrb[118].mxu1 }
 0x20d   : > { %4333 = vst [vmem:[%s5060_s21 + $0xe0] sm:$0xff] %v4129_v37   ;;  %4365 = vst [vmem:[%s5060_s21 + $0x1e0] sm:$0xff] %v4289_v38   ;;  %v2589_v45 = vadd.f32 %v5272_v32, %v2454_v39  ;;  %v2653_v46 = vadd.f32 %v5272_v32, %v2518_v40  ;;  %v2455_v47 = vmul.f32 %v5263_v63, %v1726_v43  ;;  %v1728_v49 = vpop.f32.mrb[119].mxu0  ;;  %v1984_v50 = vpop.f32.mrb[119].mxu1 }
 0x20e   : > { %v2519_v48 = vmul.f32 %v5263_v63, %v1982_v44 }
 0x20f   : > { %v2590_v51 = vadd.f32 %v5272_v32, %v2455_v47  ;;  %v2717_v53 = vmax.f32 %v2589_v45, 0.0  ;;  %v2781_v54 = vmax.f32 %v2653_v46, 0.0 }
 0x210   : > { %v2654_v52 = vadd.f32 %v5272_v32, %v2519_v48 }
 0x211   : > { %v2718_v55 = vmax.f32 %v2590_v51, 0.0 }
 0x212   : > { %v2782_v56 = vmax.f32 %v2654_v52, 0.0  ;;  %v1731_v57 = vpop.f32.mrb[120].mxu0  ;;  %v1987_v58 = vpop.f32.mrb[120].mxu1 }
 0x213   : > { %v4134_v59 = vpack.c.bf16 %v2718_v55, %v2717_v53  ;;  %v2456_v61 = vmul.f32 %v5263_v63, %v1731_v57  ;;  %v2520_v62 = vmul.f32 %v5263_v63, %v1987_v58  ;;  %v1733_v0 = vpop.f32.mrb[121].mxu0  ;;  %v1989_v2 = vpop.f32.mrb[121].mxu1 }
 0x214   : > { %v4294_v60 = vpack.c.bf16 %v2782_v56, %v2781_v54  ;;  %v1734_v3 = vpop.f32.mrb[122].mxu0  ;;  %v1990_v4 = vpop.f32.mrb[122].mxu1 }
 0x215   : > { %4334 = vst [vmem:[%s5060_s21 + $0xe8] sm:$0xff] %v4134_v59   ;;  %v2591_v5 = vadd.f32 %v5272_v32, %v2456_v61  ;;  %v2655_v6 = vadd.f32 %v5272_v32, %v2520_v62  ;;  %v2457_v7 = vmul.f32 %v5263_v63, %v1734_v3  ;;  %v2521_v8 = vmul.f32 %v5263_v63, %v1990_v4  ;;  %v1736_v9 = vpop.f32.mrb[123].mxu0  ;;  %v1992_v10 = vpop.f32.mrb[123].mxu1 }
 0x216   : > { %4366 = vst [vmem:[%s5060_s21 + $0x1e8] sm:$0xff] %v4294_v60  }
 0x217   : > { %v2592_v11 = vadd.f32 %v5272_v32, %v2457_v7  ;;  %v2656_v12 = vadd.f32 %v5272_v32, %v2521_v8  ;;  %v2719_v13 = vmax.f32 %v2591_v5, 0.0  ;;  %v2783_v14 = vmax.f32 %v2655_v6, 0.0 }
 0x219   : > { %v2720_v15 = vmax.f32 %v2592_v11, 0.0  ;;  %v2784_v16 = vmax.f32 %v2656_v12, 0.0 }
 0x21a   : > { %v1739_v17 = vpop.f32.mrb[124].mxu0  ;;  %v1995_v18 = vpop.f32.mrb[124].mxu1 }
 0x21b   : > { %v4139_v19 = vpack.c.bf16 %v2720_v15, %v2719_v13  ;;  %v4299_v20 = vpack.c.bf16 %v2784_v16, %v2783_v14  ;;  %v2458_v21 = vmul.f32 %v5263_v63, %v1739_v17  ;;  %v2522_v22 = vmul.f32 %v5263_v63, %v1995_v18  ;;  %v1741_v23 = vpop.f32.mrb[125].mxu0  ;;  %v1997_v24 = vpop.f32.mrb[125].mxu1 }
 0x21c   : > { %v1742_v25 = vpop.f32.mrb[126].mxu0  ;;  %v1998_v26 = vpop.f32.mrb[126].mxu1 }
 0x21d   : > { %4335 = vst [vmem:[%s5060_s21 + $0xf0] sm:$0xff] %v4139_v19   ;;  %4367 = vst [vmem:[%s5060_s21 + $0x1f0] sm:$0xff] %v4299_v20   ;;  %v2593_v27 = vadd.f32 %v5272_v32, %v2458_v21  ;;  %v2657_v28 = vadd.f32 %v5272_v32, %v2522_v22  ;;  %v2459_v1 = vmul.f32 %v5263_v63, %v1742_v25  ;;  %v1744_v30 = vpop.f32.mrb[127].mxu0  ;;  %v2000_v31 = vpop.f32.mrb[127].mxu1 }
 0x21e   : > { %v2523_v29 = vmul.f32 %v5263_v63, %v1998_v26 }
 0x21f   : > { %v2594_v33 = vadd.f32 %v5272_v32, %v2459_v1  ;;  %v2721_v35 = vmax.f32 %v2593_v27, 0.0  ;;  %v2785_v36 = vmax.f32 %v2657_v28, 0.0 }
 0x220   : > { %v2658_v34 = vadd.f32 %v5272_v32, %v2523_v29 }
 0x221   : > { %v2722_v37 = vmax.f32 %v2594_v33, 0.0 }
 0x222   : > { %v2786_v38 = vmax.f32 %v2658_v34, 0.0 }
 0x223   : > { %v4144_v63 = vpack.c.bf16 %v2722_v37, %v2721_v35 }
 0x224   : > { %v4304_v39 = vpack.c.bf16 %v2786_v38, %v2785_v36 }
 0x225   : > { %4336 = vst [vmem:[%s5060_s21 + $0xf8] sm:$0xff] %v4144_v63  }
 0x226   : > { %4368 = vst [vmem:[%s5060_s21 + $0x1f8] sm:$0xff] %v4304_v39  }
 0x227   : > { %4682 = shalt.err (!%p4679_p5)
}
 0x228   : > { %s4683_s13 = scalar_lea.hbm %s5395_s8, 8192  ;;  %s4687_s24 = scalar_lea.hbm %s5453_s4, 16384 }
 0x229   : > { %p4684_p6 = scmp.ne.s32.totalorder %s5395_s8, %s4683_s13  ;;  %p4688_p10 = scmp.lt.u32.totalorder %s5395_s8, %s5453_s4 }
 0x22a   : > { %p4689_p11 = scmp.lt.u32.totalorder %s4687_s24, %s4683_s13  ;;  %p4691_p13 = scmp.lt.u32.totalorder %s4683_s13, %s5395_s8 }
 0x22b   : > { %p4685_p7 = pnand %p4684_p6, %p4818_p4 }
 0x22c   : > { %p4690_p12 = por %p4689_p11, %p4688_p10 }
 0x22d   : > { %p4686_p9 = pneg %p4685_p7 }
 0x22e   : > { %p4692_p0 = por %p4691_p13, %p4690_p12 }
 0x230   : > { %p4693_p1 = pnand %p4692_p0, %p4686_p9 }
 0x232   : > { %4696 = shalt.err (!%p4693_p1)
}
 0x233   : > { %s4751_s29 = smov 64   ;;  %s4752_s30 = smov 4  }
 0x234   : > { %4401 = dma.vmem_to_hbm [thread:$0]  (%p4818_p4), %s5397_s5, 8192, %s5395_s8, %s5403_s18, %s4751_s29, %s4751_s29, %s4752_s30  }
 0x235 PF: > { %p4407_p2 = scmp.ge.s32.totalorder %s4747_s20, 2  ;;  %s3457_s6 = sand.u32 1, %s4727_s15  }
 0x236   : > { %s3458_s7 = scalar_lea.sflag [#allocation4], %s3457_s6 }
 0x237   : > { %p4404_p3 = pnand %p4407_p2, %p4825_p8 }
 0x239   : > { %4722 = dma.done.wait (!%p4404_p3), %s3458_s7, 8192  }
 0x23a   : > { %4724 = vsyncadd (!%p4404_p3), %s3458_s7, 4294959104  ;;  %s17_s20 = sadd.s32 1, %s4747_s20   ;;  %s5456_s15 = smov %s4731_s16 }
 0x23b   : > { %p14_p5 = scmp.ge.s32.totalorder %s17_s20, 4   ;;  %s5457_s16 = smov %s4735_s17 }
 0x23c   : > { %s5458_s17 = smov %s4831_s28  ;;  %s5459_s18 = smov %s4743_s19 }
 0x23d   : > { %s5460_s19 = smov %s5462_s23  ;;  %16 = sbr.rel (!%p14_p5) target bundleno = 4 (0x4), region = 88 }
 0x244   :  { %3463 = vsyncpa [#allocation4], 1 }
 0x245   :  { %3465 = vsyncpa [#allocation4 + $0x1], 1 }

</bundles_post_ra>
